<compile_context>
chip_gen: v5e
topology: v5e:2x2
jax: 0.10.0
libtpu: 0.0.40
codegen_flags: <defaults>
</compile_context>

<pallas_src>
import functools

import jax
import jax.numpy as jnp
from jax.experimental import pallas as pl
from jax.experimental.pallas import tpu as pltpu


def _round_up(a, b):
    return (a + b - 1) // b * b


def _divisors_desc(n):
    return [d for d in range(n, 0, -1) if n % d == 0]


def _vmem_capacity_bytes():
    try:
        return int(pltpu.get_tpu_info().vmem_capacity_bytes)
    except Exception:
        return 64 * 1024 * 1024  # conservative default (v7x per-core VMEM)


# -----------------------------------------------------------------------------
# Optimized kernel: lane-dense input blocks, on-chip relayout, wide stores.
# -----------------------------------------------------------------------------
def _patcher_kernel(x_ref, o_ref, *, C, p, Lw, tlh, G, Q):
    # x_ref: (1, C, tlh*p, W)      lane-dense strip of input image rows
    # o_ref: (1, tlh, Lw*C*p*p)    matching rows of the patched output
    pp = p * p
    CPP = C * pp
    n_groups = tlh // G

    def do_group(r0):
        # r0 = first patch-row of this group.  One sublane-strided load per
        # (c, kh): the G image rows 'lh*p + kh' feeding this group's patches,
        # full width -> (G, W); lane order within a row is (lw, kw).
        rows = [[x_ref[0, c, pl.ds(r0 * p + kh, G, p), :] for kh in range(p)]
                for c in range(C)]
        # Assemble Q patch-columns worth of output lanes per store.  Lane order
        # must be (lw, c, kh, kw) to match Unfold's (c, kh, kw) feature order.
        for lw0 in range(0, Lw, Q):
            pieces = []
            for lw in range(lw0, lw0 + Q):
                for c in range(C):
                    for kh in range(p):
                        pieces.append(rows[c][kh][:, lw * p:(lw + 1) * p])
            chunk = jnp.concatenate(pieces, axis=-1)          # (G, Q*CPP)
            o_ref[0, pl.ds(r0, G), lw0 * CPP:(lw0 + Q) * CPP] = chunk

    if n_groups == 1:
        do_group(0)
    else:
        # Decouple unroll count from tile size (bounded live ranges / IR size).
        @pl.loop(0, n_groups)
        def _(g):
            do_group(pl.multiple_of(g * G, G))


def _select_tile(N, C, H, W, p, Lh, Lw, itemsize, vmem_budget):
    """Pick tlh = patch-rows per grid step.  Returns (tlh, need_crop)."""
    CPP = C * p * p

    def padded_block_bytes(tlh):
        # VMEM bytes of one input / output block, counting (8, 128) layout
        # padding of the minor two dims (review #3).
        in_b = C * _round_up(tlh * p, 8) * _round_up(W, 128) * itemsize
        out_b = _round_up(tlh, 8) * _round_up(Lw * CPP, 128) * itemsize
        return in_b, out_b

    def fits(tlh):
        in_b, out_b = padded_block_bytes(tlh)
        # x2: Pallas double-buffers every in/out block.
        return (2 * (in_b + out_b) <= vmem_budget
                and tlh * p * W * C * itemsize <= (8 << 20))  # ~8 MiB logical

    def legal(tlh, cropped):
        # (8,128) rule: second-minor block dims must be %8==0 or the full dim.
        h_full = Lh * p if cropped else H
        in_ok = (tlh * p) % 8 == 0 or tlh * p == h_full
        out_ok = tlh % 8 == 0 or tlh == Lh
        return in_ok and out_ok

    min_steps = min(4, N * Lh)  # relaxed: a few steps suffice to pipeline (#8)
    for enforce_steps in (True, False):
        for cand in _divisors_desc(Lh):
            if not legal(cand, cropped=False) or not fits(cand):
                continue
            if enforce_steps and N * (Lh // cand) < min_steps:
                continue
            return cand, False
    # Ragged H with no layout-legal uncropped tiling (rare): crop, costs a copy.
    for cand in _divisors_desc(Lh):
        if legal(cand, cropped=True) and fits(cand):
            return cand, True
    return Lh, True  # last resort: full-height blocks


def _patcher_optimized(x, p, N, C, H, W, Lh, Lw):
    CPP = C * p * p
    itemsize = x.dtype.itemsize
    vmem_cap = _vmem_capacity_bytes()

    tlh, need_crop = _select_tile(N, C, H, W, p, Lh, Lw, itemsize,
                                  vmem_budget=int(vmem_cap * 0.55))
    if need_crop and H != Lh * p:
        # Only the H border may need cropping; the W border is simply never
        # read by the kernel (lane slices stop at Lw*p).
        x = x[:, :, :Lh * p, :]
        H = Lh * p

    # Store grouping: G patch-rows per store (full 8-sublane stores when
    # possible) and Q patch-columns per store (>=128 lanes when possible).
    G = 8 if tlh % 8 == 0 else tlh
    Q = 1
    for d in _divisors_desc(Lw):
        if d * CPP <= 2048 and d * C * p <= 512:
            Q = d
            break

    in_b = C * _round_up(tlh * p, 8) * _round_up(W, 128) * itemsize
    out_b = _round_up(tlh, 8) * _round_up(Lw * CPP, 128) * itemsize
    vmem_limit = min(int(vmem_cap * 0.9),
                     max(32 << 20, 2 * (in_b + out_b) + (8 << 20)))

    kernel = functools.partial(_patcher_kernel, C=C, p=p, Lw=Lw,
                               tlh=tlh, G=G, Q=Q)
    out3 = pl.pallas_call(
        kernel,
        out_shape=jax.ShapeDtypeStruct((N, Lh, Lw * CPP), x.dtype),
        grid_spec=pltpu.PrefetchScalarGridSpec(
            num_scalar_prefetch=0,
            grid=(N, Lh // tlh),
            in_specs=[
                # Lane-dense input strip: minor dim = full W -> contiguous DMA.
                pl.BlockSpec((1, C, tlh * p, W), lambda n, i: (n, 0, i, 0)),
            ],
            # Wide, lane-dense output slab; reshape to (N, L, CPP) is free.
            out_specs=pl.BlockSpec((1, tlh, Lw * CPP), lambda n, i: (n, i, 0)),
        ),
        compiler_params=pltpu.CompilerParams(
            dimension_semantics=("parallel", "parallel"),
            vmem_limit_bytes=vmem_limit,
        ),
        cost_estimate=pl.CostEstimate(
            flops=0, transcendentals=0,
            bytes_accessed=2 * N * C * (Lh * p) * (Lw * p) * itemsize),
    )(x)
    return out3.reshape(N, Lh * Lw, CPP)


# -----------------------------------------------------------------------------
# Fallback (previously validated narrow-store kernel) -- robustness net only.
# -----------------------------------------------------------------------------
def _patcher_kernel_fallback(x_ref, o_ref, *, C, p):
    # x_ref: (1, C, 1, p, Lw, p);  o_ref: (1, 1, Lw, C*p*p)
    pp = p * p
    for c in range(C):
        for kh in range(p):
            col = c * pp + kh * p
            o_ref[0, 0, :, col:col + p] = x_ref[0, c, 0, kh, :, :]


def _patcher_fallback(x, p, N, C, H, W, Lh, Lw):
    CPP = C * p * p
    if H != Lh * p or W != Lw * p:
        x = x[:, :, :Lh * p, :Lw * p]
    x6 = x.reshape(N, C, Lh, p, Lw, p)
    out4 = pl.pallas_call(
        functools.partial(_patcher_kernel_fallback, C=C, p=p),
        out_shape=jax.ShapeDtypeStruct((N, Lh, Lw, CPP), x.dtype),
        grid_spec=pltpu.PrefetchScalarGridSpec(
            num_scalar_prefetch=0,
            grid=(N, Lh),
            in_specs=[pl.BlockSpec((1, C, 1, p, Lw, p),
                                   lambda n, i: (n, 0, i, 0, 0, 0))],
            out_specs=pl.BlockSpec((1, 1, Lw, CPP),
                                   lambda n, i: (n, i, 0, 0)),
        ),
        compiler_params=pltpu.CompilerParams(
            dimension_semantics=("parallel", "parallel"),
            vmem_limit_bytes=32 * 1024 * 1024,
        ),
    )(x6)
    return out4.reshape(N, Lh * Lw, CPP)


def patcher_forward(x, patch_size):
    """torch.nn.Unfold(kernel_size=p, stride=p) + moveaxis(2, 1).

    Args:
      x: (N, C, H, W)
      patch_size: int p
    Returns:
      (N, L, C*p*p) with L = (H//p)*(W//p), feature order (c, kh, kw).
    """
    p = int(patch_size)
    N, C, H, W = x.shape
    Lh, Lw = H // p, W // p
    try:
        return _patcher_optimized(x, p, N, C, H, W, Lh, Lw)
    except Exception:
        # If the optimized relayout fails to lower on some (shape, dtype,
        # toolchain) combination, fall back to the simple validated kernel.
        # (Only catches in eager execution; under jit the optimized path is
        # expected to compile.)
        return _patcher_fallback(x, p, N, C, H, W, Lh, Lw)


if __name__ == "__main__":
    key = jax.random.PRNGKey(0)

    # Small shapes consistent with the module: batch=2, channels=4, spatial=16, patch=4.
    N, C, H, W = 2, 4, 16, 16
    p = 4

    x = jax.random.normal(key, (N, C, H, W), dtype=jnp.float32)

    out = patcher_forward(x, p)
    out = jax.block_until_ready(out)

    # Pure-JAX reference of torch.nn.Unfold(p, stride=p) + moveaxis(2, 1).
    Lh, Lw = H // p, W // p
    ref = x.reshape(N, C, Lh, p, Lw, p)
    ref = jnp.transpose(ref, (0, 2, 4, 1, 3, 5)).reshape(N, Lh * Lw, C * p * p)

    assert out.shape == (N, Lh * Lw, C * p * p)
    assert jnp.array_equal(out, ref)

    print("KERNEL_OK")
</pallas_src>

<mosaic_0001>
module attributes {stable_mosaic.version = 11 : i64} {
  func.func @_patcher_kernel(%arg0: i32, %arg1: i32, %arg2: memref<1x4x16x16xf32, #tpu.memory_space<vmem>>, %arg3: memref<1x4x256xf32, #tpu.memory_space<vmem>>) attributes {dimension_semantics = [#tpu.dimension_semantics<parallel>, #tpu.dimension_semantics<parallel>], iteration_bounds = array<i64: 2, 1>, scalar_prefetch = 0 : i64, scratch_operands = 0 : i64, tpu.core_type = #tpu.core_type<tc>, window_params = [{transform_indices = @transform_0, window_bounds = array<i64: 1, 4, 16, 16>}, {transform_indices = @transform_1, window_bounds = array<i64: 1, 4, 256>}]} {
    %c0 = arith.constant 0 : index
    %c0_0 = arith.constant 0 : index
    %c0_1 = arith.constant 0 : index
    %c0_2 = arith.constant 0 : index
    %0 = tpu.strided_load %arg2[%c0, %c0_0, %c0_1, %c0_2] {strides = array<i32: 1, 1, 4, 1>} : memref<1x4x16x16xf32, #tpu.memory_space<vmem>>, vector<1x1x4x16xf32>
    %1 = vector.shape_cast %0 : vector<1x1x4x16xf32> to vector<4x16xf32>
    %c0_3 = arith.constant 0 : index
    %c0_4 = arith.constant 0 : index
    %c1 = arith.constant 1 : index
    %c0_5 = arith.constant 0 : index
    %2 = tpu.strided_load %arg2[%c0_3, %c0_4, %c1, %c0_5] {strides = array<i32: 1, 1, 4, 1>} : memref<1x4x16x16xf32, #tpu.memory_space<vmem>>, vector<1x1x4x16xf32>
    %3 = vector.shape_cast %2 : vector<1x1x4x16xf32> to vector<4x16xf32>
    %c0_6 = arith.constant 0 : index
    %c0_7 = arith.constant 0 : index
    %c2 = arith.constant 2 : index
    %c0_8 = arith.constant 0 : index
    %4 = tpu.strided_load %arg2[%c0_6, %c0_7, %c2, %c0_8] {strides = array<i32: 1, 1, 4, 1>} : memref<1x4x16x16xf32, #tpu.memory_space<vmem>>, vector<1x1x4x16xf32>
    %5 = vector.shape_cast %4 : vector<1x1x4x16xf32> to vector<4x16xf32>
    %c0_9 = arith.constant 0 : index
    %c0_10 = arith.constant 0 : index
    %c3 = arith.constant 3 : index
    %c0_11 = arith.constant 0 : index
    %6 = tpu.strided_load %arg2[%c0_9, %c0_10, %c3, %c0_11] {strides = array<i32: 1, 1, 4, 1>} : memref<1x4x16x16xf32, #tpu.memory_space<vmem>>, vector<1x1x4x16xf32>
    %7 = vector.shape_cast %6 : vector<1x1x4x16xf32> to vector<4x16xf32>
    %c0_12 = arith.constant 0 : index
    %c1_13 = arith.constant 1 : index
    %c0_14 = arith.constant 0 : index
    %c0_15 = arith.constant 0 : index
    %8 = tpu.strided_load %arg2[%c0_12, %c1_13, %c0_14, %c0_15] {strides = array<i32: 1, 1, 4, 1>} : memref<1x4x16x16xf32, #tpu.memory_space<vmem>>, vector<1x1x4x16xf32>
    %9 = vector.shape_cast %8 : vector<1x1x4x16xf32> to vector<4x16xf32>
    %c0_16 = arith.constant 0 : index
    %c1_17 = arith.constant 1 : index
    %c1_18 = arith.constant 1 : index
    %c0_19 = arith.constant 0 : index
    %10 = tpu.strided_load %arg2[%c0_16, %c1_17, %c1_18, %c0_19] {strides = array<i32: 1, 1, 4, 1>} : memref<1x4x16x16xf32, #tpu.memory_space<vmem>>, vector<1x1x4x16xf32>
    %11 = vector.shape_cast %10 : vector<1x1x4x16xf32> to vector<4x16xf32>
    %c0_20 = arith.constant 0 : index
    %c1_21 = arith.constant 1 : index
    %c2_22 = arith.constant 2 : index
    %c0_23 = arith.constant 0 : index
    %12 = tpu.strided_load %arg2[%c0_20, %c1_21, %c2_22, %c0_23] {strides = array<i32: 1, 1, 4, 1>} : memref<1x4x16x16xf32, #tpu.memory_space<vmem>>, vector<1x1x4x16xf32>
    %13 = vector.shape_cast %12 : vector<1x1x4x16xf32> to vector<4x16xf32>
    %c0_24 = arith.constant 0 : index
    %c1_25 = arith.constant 1 : index
    %c3_26 = arith.constant 3 : index
    %c0_27 = arith.constant 0 : index
    %14 = tpu.strided_load %arg2[%c0_24, %c1_25, %c3_26, %c0_27] {strides = array<i32: 1, 1, 4, 1>} : memref<1x4x16x16xf32, #tpu.memory_space<vmem>>, vector<1x1x4x16xf32>
    %15 = vector.shape_cast %14 : vector<1x1x4x16xf32> to vector<4x16xf32>
    %c0_28 = arith.constant 0 : index
    %c2_29 = arith.constant 2 : index
    %c0_30 = arith.constant 0 : index
    %c0_31 = arith.constant 0 : index
    %16 = tpu.strided_load %arg2[%c0_28, %c2_29, %c0_30, %c0_31] {strides = array<i32: 1, 1, 4, 1>} : memref<1x4x16x16xf32, #tpu.memory_space<vmem>>, vector<1x1x4x16xf32>
    %17 = vector.shape_cast %16 : vector<1x1x4x16xf32> to vector<4x16xf32>
    %c0_32 = arith.constant 0 : index
    %c2_33 = arith.constant 2 : index
    %c1_34 = arith.constant 1 : index
    %c0_35 = arith.constant 0 : index
    %18 = tpu.strided_load %arg2[%c0_32, %c2_33, %c1_34, %c0_35] {strides = array<i32: 1, 1, 4, 1>} : memref<1x4x16x16xf32, #tpu.memory_space<vmem>>, vector<1x1x4x16xf32>
    %19 = vector.shape_cast %18 : vector<1x1x4x16xf32> to vector<4x16xf32>
    %c0_36 = arith.constant 0 : index
    %c2_37 = arith.constant 2 : index
    %c2_38 = arith.constant 2 : index
    %c0_39 = arith.constant 0 : index
    %20 = tpu.strided_load %arg2[%c0_36, %c2_37, %c2_38, %c0_39] {strides = array<i32: 1, 1, 4, 1>} : memref<1x4x16x16xf32, #tpu.memory_space<vmem>>, vector<1x1x4x16xf32>
    %21 = vector.shape_cast %20 : vector<1x1x4x16xf32> to vector<4x16xf32>
    %c0_40 = arith.constant 0 : index
    %c2_41 = arith.constant 2 : index
    %c3_42 = arith.constant 3 : index
    %c0_43 = arith.constant 0 : index
    %22 = tpu.strided_load %arg2[%c0_40, %c2_41, %c3_42, %c0_43] {strides = array<i32: 1, 1, 4, 1>} : memref<1x4x16x16xf32, #tpu.memory_space<vmem>>, vector<1x1x4x16xf32>
    %23 = vector.shape_cast %22 : vector<1x1x4x16xf32> to vector<4x16xf32>
    %c0_44 = arith.constant 0 : index
    %c3_45 = arith.constant 3 : index
    %c0_46 = arith.constant 0 : index
    %c0_47 = arith.constant 0 : index
    %24 = tpu.strided_load %arg2[%c0_44, %c3_45, %c0_46, %c0_47] {strides = array<i32: 1, 1, 4, 1>} : memref<1x4x16x16xf32, #tpu.memory_space<vmem>>, vector<1x1x4x16xf32>
    %25 = vector.shape_cast %24 : vector<1x1x4x16xf32> to vector<4x16xf32>
    %c0_48 = arith.constant 0 : index
    %c3_49 = arith.constant 3 : index
    %c1_50 = arith.constant 1 : index
    %c0_51 = arith.constant 0 : index
    %26 = tpu.strided_load %arg2[%c0_48, %c3_49, %c1_50, %c0_51] {strides = array<i32: 1, 1, 4, 1>} : memref<1x4x16x16xf32, #tpu.memory_space<vmem>>, vector<1x1x4x16xf32>
    %27 = vector.shape_cast %26 : vector<1x1x4x16xf32> to vector<4x16xf32>
    %c0_52 = arith.constant 0 : index
    %c3_53 = arith.constant 3 : index
    %c2_54 = arith.constant 2 : index
    %c0_55 = arith.constant 0 : index
    %28 = tpu.strided_load %arg2[%c0_52, %c3_53, %c2_54, %c0_55] {strides = array<i32: 1, 1, 4, 1>} : memref<1x4x16x16xf32, #tpu.memory_space<vmem>>, vector<1x1x4x16xf32>
    %29 = vector.shape_cast %28 : vector<1x1x4x16xf32> to vector<4x16xf32>
    %c0_56 = arith.constant 0 : index
    %c3_57 = arith.constant 3 : index
    %c3_58 = arith.constant 3 : index
    %c0_59 = arith.constant 0 : index
    %30 = tpu.strided_load %arg2[%c0_56, %c3_57, %c3_58, %c0_59] {strides = array<i32: 1, 1, 4, 1>} : memref<1x4x16x16xf32, #tpu.memory_space<vmem>>, vector<1x1x4x16xf32>
    %31 = vector.shape_cast %30 : vector<1x1x4x16xf32> to vector<4x16xf32>
    %32 = vector.extract_strided_slice %1 {offsets = [0, 0], sizes = [4, 4], strides = [1, 1]} : vector<4x16xf32> to vector<4x4xf32>
    %33 = vector.extract_strided_slice %3 {offsets = [0, 0], sizes = [4, 4], strides = [1, 1]} : vector<4x16xf32> to vector<4x4xf32>
    %34 = vector.extract_strided_slice %5 {offsets = [0, 0], sizes = [4, 4], strides = [1, 1]} : vector<4x16xf32> to vector<4x4xf32>
    %35 = vector.extract_strided_slice %7 {offsets = [0, 0], sizes = [4, 4], strides = [1, 1]} : vector<4x16xf32> to vector<4x4xf32>
    %36 = vector.extract_strided_slice %9 {offsets = [0, 0], sizes = [4, 4], strides = [1, 1]} : vector<4x16xf32> to vector<4x4xf32>
    %37 = vector.extract_strided_slice %11 {offsets = [0, 0], sizes = [4, 4], strides = [1, 1]} : vector<4x16xf32> to vector<4x4xf32>
    %38 = vector.extract_strided_slice %13 {offsets = [0, 0], sizes = [4, 4], strides = [1, 1]} : vector<4x16xf32> to vector<4x4xf32>
    %39 = vector.extract_strided_slice %15 {offsets = [0, 0], sizes = [4, 4], strides = [1, 1]} : vector<4x16xf32> to vector<4x4xf32>
    %40 = vector.extract_strided_slice %17 {offsets = [0, 0], sizes = [4, 4], strides = [1, 1]} : vector<4x16xf32> to vector<4x4xf32>
    %41 = vector.extract_strided_slice %19 {offsets = [0, 0], sizes = [4, 4], strides = [1, 1]} : vector<4x16xf32> to vector<4x4xf32>
    %42 = vector.extract_strided_slice %21 {offsets = [0, 0], sizes = [4, 4], strides = [1, 1]} : vector<4x16xf32> to vector<4x4xf32>
    %43 = vector.extract_strided_slice %23 {offsets = [0, 0], sizes = [4, 4], strides = [1, 1]} : vector<4x16xf32> to vector<4x4xf32>
    %44 = vector.extract_strided_slice %25 {offsets = [0, 0], sizes = [4, 4], strides = [1, 1]} : vector<4x16xf32> to vector<4x4xf32>
    %45 = vector.extract_strided_slice %27 {offsets = [0, 0], sizes = [4, 4], strides = [1, 1]} : vector<4x16xf32> to vector<4x4xf32>
    %46 = vector.extract_strided_slice %29 {offsets = [0, 0], sizes = [4, 4], strides = [1, 1]} : vector<4x16xf32> to vector<4x4xf32>
    %47 = vector.extract_strided_slice %31 {offsets = [0, 0], sizes = [4, 4], strides = [1, 1]} : vector<4x16xf32> to vector<4x4xf32>
    %48 = vector.extract_strided_slice %1 {offsets = [0, 4], sizes = [4, 4], strides = [1, 1]} : vector<4x16xf32> to vector<4x4xf32>
    %49 = vector.extract_strided_slice %3 {offsets = [0, 4], sizes = [4, 4], strides = [1, 1]} : vector<4x16xf32> to vector<4x4xf32>
    %50 = vector.extract_strided_slice %5 {offsets = [0, 4], sizes = [4, 4], strides = [1, 1]} : vector<4x16xf32> to vector<4x4xf32>
    %51 = vector.extract_strided_slice %7 {offsets = [0, 4], sizes = [4, 4], strides = [1, 1]} : vector<4x16xf32> to vector<4x4xf32>
    %52 = vector.extract_strided_slice %9 {offsets = [0, 4], sizes = [4, 4], strides = [1, 1]} : vector<4x16xf32> to vector<4x4xf32>
    %53 = vector.extract_strided_slice %11 {offsets = [0, 4], sizes = [4, 4], strides = [1, 1]} : vector<4x16xf32> to vector<4x4xf32>
    %54 = vector.extract_strided_slice %13 {offsets = [0, 4], sizes = [4, 4], strides = [1, 1]} : vector<4x16xf32> to vector<4x4xf32>
    %55 = vector.extract_strided_slice %15 {offsets = [0, 4], sizes = [4, 4], strides = [1, 1]} : vector<4x16xf32> to vector<4x4xf32>
    %56 = vector.extract_strided_slice %17 {offsets = [0, 4], sizes = [4, 4], strides = [1, 1]} : vector<4x16xf32> to vector<4x4xf32>
    %57 = vector.extract_strided_slice %19 {offsets = [0, 4], sizes = [4, 4], strides = [1, 1]} : vector<4x16xf32> to vector<4x4xf32>
    %58 = vector.extract_strided_slice %21 {offsets = [0, 4], sizes = [4, 4], strides = [1, 1]} : vector<4x16xf32> to vector<4x4xf32>
    %59 = vector.extract_strided_slice %23 {offsets = [0, 4], sizes = [4, 4], strides = [1, 1]} : vector<4x16xf32> to vector<4x4xf32>
    %60 = vector.extract_strided_slice %25 {offsets = [0, 4], sizes = [4, 4], strides = [1, 1]} : vector<4x16xf32> to vector<4x4xf32>
    %61 = vector.extract_strided_slice %27 {offsets = [0, 4], sizes = [4, 4], strides = [1, 1]} : vector<4x16xf32> to vector<4x4xf32>
    %62 = vector.extract_strided_slice %29 {offsets = [0, 4], sizes = [4, 4], strides = [1, 1]} : vector<4x16xf32> to vector<4x4xf32>
    %63 = vector.extract_strided_slice %31 {offsets = [0, 4], sizes = [4, 4], strides = [1, 1]} : vector<4x16xf32> to vector<4x4xf32>
    %64 = vector.extract_strided_slice %1 {offsets = [0, 8], sizes = [4, 4], strides = [1, 1]} : vector<4x16xf32> to vector<4x4xf32>
    %65 = vector.extract_strided_slice %3 {offsets = [0, 8], sizes = [4, 4], strides = [1, 1]} : vector<4x16xf32> to vector<4x4xf32>
    %66 = vector.extract_strided_slice %5 {offsets = [0, 8], sizes = [4, 4], strides = [1, 1]} : vector<4x16xf32> to vector<4x4xf32>
    %67 = vector.extract_strided_slice %7 {offsets = [0, 8], sizes = [4, 4], strides = [1, 1]} : vector<4x16xf32> to vector<4x4xf32>
    %68 = vector.extract_strided_slice %9 {offsets = [0, 8], sizes = [4, 4], strides = [1, 1]} : vector<4x16xf32> to vector<4x4xf32>
    %69 = vector.extract_strided_slice %11 {offsets = [0, 8], sizes = [4, 4], strides = [1, 1]} : vector<4x16xf32> to vector<4x4xf32>
    %70 = vector.extract_strided_slice %13 {offsets = [0, 8], sizes = [4, 4], strides = [1, 1]} : vector<4x16xf32> to vector<4x4xf32>
    %71 = vector.extract_strided_slice %15 {offsets = [0, 8], sizes = [4, 4], strides = [1, 1]} : vector<4x16xf32> to vector<4x4xf32>
    %72 = vector.extract_strided_slice %17 {offsets = [0, 8], sizes = [4, 4], strides = [1, 1]} : vector<4x16xf32> to vector<4x4xf32>
    %73 = vector.extract_strided_slice %19 {offsets = [0, 8], sizes = [4, 4], strides = [1, 1]} : vector<4x16xf32> to vector<4x4xf32>
    %74 = vector.extract_strided_slice %21 {offsets = [0, 8], sizes = [4, 4], strides = [1, 1]} : vector<4x16xf32> to vector<4x4xf32>
    %75 = vector.extract_strided_slice %23 {offsets = [0, 8], sizes = [4, 4], strides = [1, 1]} : vector<4x16xf32> to vector<4x4xf32>
    %76 = vector.extract_strided_slice %25 {offsets = [0, 8], sizes = [4, 4], strides = [1, 1]} : vector<4x16xf32> to vector<4x4xf32>
    %77 = vector.extract_strided_slice %27 {offsets = [0, 8], sizes = [4, 4], strides = [1, 1]} : vector<4x16xf32> to vector<4x4xf32>
    %78 = vector.extract_strided_slice %29 {offsets = [0, 8], sizes = [4, 4], strides = [1, 1]} : vector<4x16xf32> to vector<4x4xf32>
    %79 = vector.extract_strided_slice %31 {offsets = [0, 8], sizes = [4, 4], strides = [1, 1]} : vector<4x16xf32> to vector<4x4xf32>
    %80 = vector.extract_strided_slice %1 {offsets = [0, 12], sizes = [4, 4], strides = [1, 1]} : vector<4x16xf32> to vector<4x4xf32>
    %81 = vector.extract_strided_slice %3 {offsets = [0, 12], sizes = [4, 4], strides = [1, 1]} : vector<4x16xf32> to vector<4x4xf32>
    %82 = vector.extract_strided_slice %5 {offsets = [0, 12], sizes = [4, 4], strides = [1, 1]} : vector<4x16xf32> to vector<4x4xf32>
    %83 = vector.extract_strided_slice %7 {offsets = [0, 12], sizes = [4, 4], strides = [1, 1]} : vector<4x16xf32> to vector<4x4xf32>
    %84 = vector.extract_strided_slice %9 {offsets = [0, 12], sizes = [4, 4], strides = [1, 1]} : vector<4x16xf32> to vector<4x4xf32>
    %85 = vector.extract_strided_slice %11 {offsets = [0, 12], sizes = [4, 4], strides = [1, 1]} : vector<4x16xf32> to vector<4x4xf32>
    %86 = vector.extract_strided_slice %13 {offsets = [0, 12], sizes = [4, 4], strides = [1, 1]} : vector<4x16xf32> to vector<4x4xf32>
    %87 = vector.extract_strided_slice %15 {offsets = [0, 12], sizes = [4, 4], strides = [1, 1]} : vector<4x16xf32> to vector<4x4xf32>
    %88 = vector.extract_strided_slice %17 {offsets = [0, 12], sizes = [4, 4], strides = [1, 1]} : vector<4x16xf32> to vector<4x4xf32>
    %89 = vector.extract_strided_slice %19 {offsets = [0, 12], sizes = [4, 4], strides = [1, 1]} : vector<4x16xf32> to vector<4x4xf32>
    %90 = vector.extract_strided_slice %21 {offsets = [0, 12], sizes = [4, 4], strides = [1, 1]} : vector<4x16xf32> to vector<4x4xf32>
    %91 = vector.extract_strided_slice %23 {offsets = [0, 12], sizes = [4, 4], strides = [1, 1]} : vector<4x16xf32> to vector<4x4xf32>
    %92 = vector.extract_strided_slice %25 {offsets = [0, 12], sizes = [4, 4], strides = [1, 1]} : vector<4x16xf32> to vector<4x4xf32>
    %93 = vector.extract_strided_slice %27 {offsets = [0, 12], sizes = [4, 4], strides = [1, 1]} : vector<4x16xf32> to vector<4x4xf32>
    %94 = vector.extract_strided_slice %29 {offsets = [0, 12], sizes = [4, 4], strides = [1, 1]} : vector<4x16xf32> to vector<4x4xf32>
    %95 = vector.extract_strided_slice %31 {offsets = [0, 12], sizes = [4, 4], strides = [1, 1]} : vector<4x16xf32> to vector<4x4xf32>
    %96 = tpu.concatenate %32, %33, %34, %35, %36, %37, %38, %39, %40, %41, %42, %43, %44, %45, %46, %47 in 1 : vector<4x4xf32>, vector<4x4xf32>, vector<4x4xf32>, vector<4x4xf32>, vector<4x4xf32>, vector<4x4xf32>, vector<4x4xf32>, vector<4x4xf32>, vector<4x4xf32>, vector<4x4xf32>, vector<4x4xf32>, vector<4x4xf32>, vector<4x4xf32>, vector<4x4xf32>, vector<4x4xf32>, vector<4x4xf32> -> vector<4x64xf32>
    %97 = tpu.concatenate %48, %49, %50, %51, %52, %53, %54, %55, %56, %57, %58, %59, %60, %61, %62, %63 in 1 : vector<4x4xf32>, vector<4x4xf32>, vector<4x4xf32>, vector<4x4xf32>, vector<4x4xf32>, vector<4x4xf32>, vector<4x4xf32>, vector<4x4xf32>, vector<4x4xf32>, vector<4x4xf32>, vector<4x4xf32>, vector<4x4xf32>, vector<4x4xf32>, vector<4x4xf32>, vector<4x4xf32>, vector<4x4xf32> -> vector<4x64xf32>
    %98 = tpu.concatenate %64, %65, %66, %67, %68, %69, %70, %71, %72, %73, %74, %75, %76, %77, %78, %79 in 1 : vector<4x4xf32>, vector<4x4xf32>, vector<4x4xf32>, vector<4x4xf32>, vector<4x4xf32>, vector<4x4xf32>, vector<4x4xf32>, vector<4x4xf32>, vector<4x4xf32>, vector<4x4xf32>, vector<4x4xf32>, vector<4x4xf32>, vector<4x4xf32>, vector<4x4xf32>, vector<4x4xf32>, vector<4x4xf32> -> vector<4x64xf32>
    %99 = tpu.concatenate %80, %81, %82, %83, %84, %85, %86, %87, %88, %89, %90, %91, %92, %93, %94, %95 in 1 : vector<4x4xf32>, vector<4x4xf32>, vector<4x4xf32>, vector<4x4xf32>, vector<4x4xf32>, vector<4x4xf32>, vector<4x4xf32>, vector<4x4xf32>, vector<4x4xf32>, vector<4x4xf32>, vector<4x4xf32>, vector<4x4xf32>, vector<4x4xf32>, vector<4x4xf32>, vector<4x4xf32>, vector<4x4xf32> -> vector<4x64xf32>
    %100 = tpu.concatenate %96, %97, %98, %99 in 1 : vector<4x64xf32>, vector<4x64xf32>, vector<4x64xf32>, vector<4x64xf32> -> vector<4x256xf32>
    %c0_60 = arith.constant 0 : index
    %c0_61 = arith.constant 0 : index
    %c0_62 = arith.constant 0 : index
    %101 = vector.load %arg3[%c0_60, %c0_61, %c0_62] : memref<1x4x256xf32, #tpu.memory_space<vmem>>, vector<1x4x256xf32>
    %102 = vector.shape_cast %101 : vector<1x4x256xf32> to vector<4x256xf32>
    %103 = vector.shape_cast %100 : vector<4x256xf32> to vector<1x4x256xf32>
    tpu.vector_store %arg3[%c0_60, %c0_61, %c0_62], %103 {strides = array<i32>} : memref<1x4x256xf32, #tpu.memory_space<vmem>>, vector<1x4x256xf32>,
    return
  }
  func.func @transform_0(%arg0: i32, %arg1: i32) -> (i32, i32, i32, i32) {
    %c0_i32 = arith.constant 0 : i32
    %c0_i32_0 = arith.constant 0 : i32
    %c0_i32_1 = arith.constant 0 : i32
    return %arg0, %c0_i32, %arg1, %c0_i32_0 : i32, i32, i32, i32
  }
  func.func @transform_1(%arg0: i32, %arg1: i32) -> (i32, i32, i32) {
    %c0_i32 = arith.constant 0 : i32
    %c0_i32_0 = arith.constant 0 : i32
    return %arg0, %arg1, %c0_i32 : i32, i32, i32
  }
}

module attributes {stable_mosaic.version = 11 : i64} {
  func.func @_patcher_kernel_fallback(%arg0: i32, %arg1: i32, %arg2: memref<1x4x1x4x4x4xf32, #tpu.memory_space<vmem>>, %arg3: memref<1x1x4x64xf32, #tpu.memory_space<vmem>>) attributes {dimension_semantics = [#tpu.dimension_semantics<parallel>, #tpu.dimension_semantics<parallel>], iteration_bounds = array<i64: 2, 4>, scalar_prefetch = 0 : i64, scratch_operands = 0 : i64, tpu.core_type = #tpu.core_type<tc>, window_params = [{transform_indices = @transform_0, window_bounds = array<i64: 1, 4, 1, 4, 4, 4>}, {transform_indices = @transform_1, window_bounds = array<i64: 1, 1, 4, 64>}]} {
    %c0 = arith.constant 0 : index
    %c0_0 = arith.constant 0 : index
    %c0_1 = arith.constant 0 : index
    %c0_2 = arith.constant 0 : index
    %c0_3 = arith.constant 0 : index
    %c0_4 = arith.constant 0 : index
    %0 = vector.load %arg2[%c0, %c0_0, %c0_1, %c0_2, %c0_3, %c0_4] : memref<1x4x1x4x4x4xf32, #tpu.memory_space<vmem>>, vector<1x1x1x1x4x4xf32>
    %1 = vector.shape_cast %0 : vector<1x1x1x1x4x4xf32> to vector<4x4xf32>
    %c0_5 = arith.constant 0 : index
    %c0_6 = arith.constant 0 : index
    %c0_7 = arith.constant 0 : index
    %c0_8 = arith.constant 0 : index
    %2 = vector.load %arg3[%c0_5, %c0_6, %c0_7, %c0_8] : memref<1x1x4x64xf32, #tpu.memory_space<vmem>>, vector<1x1x4x4xf32>
    %3 = vector.shape_cast %2 : vector<1x1x4x4xf32> to vector<4x4xf32>
    %4 = vector.shape_cast %1 : vector<4x4xf32> to vector<1x1x4x4xf32>
    tpu.vector_store %arg3[%c0_5, %c0_6, %c0_7, %c0_8], %4 {strides = array<i32>} : memref<1x1x4x64xf32, #tpu.memory_space<vmem>>, vector<1x1x4x4xf32>,
    %c0_9 = arith.constant 0 : index
    %c0_10 = arith.constant 0 : index
    %c0_11 = arith.constant 0 : index
    %c1 = arith.constant 1 : index
    %c0_12 = arith.constant 0 : index
    %c0_13 = arith.constant 0 : index
    %5 = vector.load %arg2[%c0_9, %c0_10, %c0_11, %c1, %c0_12, %c0_13] : memref<1x4x1x4x4x4xf32, #tpu.memory_space<vmem>>, vector<1x1x1x1x4x4xf32>
    %6 = vector.shape_cast %5 : vector<1x1x1x1x4x4xf32> to vector<4x4xf32>
    %c0_14 = arith.constant 0 : index
    %c0_15 = arith.constant 0 : index
    %c0_16 = arith.constant 0 : index
    %c4 = arith.constant 4 : index
    %7 = vector.load %arg3[%c0_14, %c0_15, %c0_16, %c4] : memref<1x1x4x64xf32, #tpu.memory_space<vmem>>, vector<1x1x4x4xf32>
    %8 = vector.shape_cast %7 : vector<1x1x4x4xf32> to vector<4x4xf32>
    %9 = vector.shape_cast %6 : vector<4x4xf32> to vector<1x1x4x4xf32>
    tpu.vector_store %arg3[%c0_14, %c0_15, %c0_16, %c4], %9 {strides = array<i32>} : memref<1x1x4x64xf32, #tpu.memory_space<vmem>>, vector<1x1x4x4xf32>,
    %c0_17 = arith.constant 0 : index
    %c0_18 = arith.constant 0 : index
    %c0_19 = arith.constant 0 : index
    %c2 = arith.constant 2 : index
    %c0_20 = arith.constant 0 : index
    %c0_21 = arith.constant 0 : index
    %10 = vector.load %arg2[%c0_17, %c0_18, %c0_19, %c2, %c0_20, %c0_21] : memref<1x4x1x4x4x4xf32, #tpu.memory_space<vmem>>, vector<1x1x1x1x4x4xf32>
    %11 = vector.shape_cast %10 : vector<1x1x1x1x4x4xf32> to vector<4x4xf32>
    %c0_22 = arith.constant 0 : index
    %c0_23 = arith.constant 0 : index
    %c0_24 = arith.constant 0 : index
    %c8 = arith.constant 8 : index
    %12 = vector.load %arg3[%c0_22, %c0_23, %c0_24, %c8] : memref<1x1x4x64xf32, #tpu.memory_space<vmem>>, vector<1x1x4x4xf32>
    %13 = vector.shape_cast %12 : vector<1x1x4x4xf32> to vector<4x4xf32>
    %14 = vector.shape_cast %11 : vector<4x4xf32> to vector<1x1x4x4xf32>
    tpu.vector_store %arg3[%c0_22, %c0_23, %c0_24, %c8], %14 {strides = array<i32>} : memref<1x1x4x64xf32, #tpu.memory_space<vmem>>, vector<1x1x4x4xf32>,
    %c0_25 = arith.constant 0 : index
    %c0_26 = arith.constant 0 : index
    %c0_27 = arith.constant 0 : index
    %c3 = arith.constant 3 : index
    %c0_28 = arith.constant 0 : index
    %c0_29 = arith.constant 0 : index
    %15 = vector.load %arg2[%c0_25, %c0_26, %c0_27, %c3, %c0_28, %c0_29] : memref<1x4x1x4x4x4xf32, #tpu.memory_space<vmem>>, vector<1x1x1x1x4x4xf32>
    %16 = vector.shape_cast %15 : vector<1x1x1x1x4x4xf32> to vector<4x4xf32>
    %c0_30 = arith.constant 0 : index
    %c0_31 = arith.constant 0 : index
    %c0_32 = arith.constant 0 : index
    %c12 = arith.constant 12 : index
    %17 = vector.load %arg3[%c0_30, %c0_31, %c0_32, %c12] : memref<1x1x4x64xf32, #tpu.memory_space<vmem>>, vector<1x1x4x4xf32>
    %18 = vector.shape_cast %17 : vector<1x1x4x4xf32> to vector<4x4xf32>
    %19 = vector.shape_cast %16 : vector<4x4xf32> to vector<1x1x4x4xf32>
    tpu.vector_store %arg3[%c0_30, %c0_31, %c0_32, %c12], %19 {strides = array<i32>} : memref<1x1x4x64xf32, #tpu.memory_space<vmem>>, vector<1x1x4x4xf32>,
    %c0_33 = arith.constant 0 : index
    %c1_34 = arith.constant 1 : index
    %c0_35 = arith.constant 0 : index
    %c0_36 = arith.constant 0 : index
    %c0_37 = arith.constant 0 : index
    %c0_38 = arith.constant 0 : index
    %20 = vector.load %arg2[%c0_33, %c1_34, %c0_35, %c0_36, %c0_37, %c0_38] : memref<1x4x1x4x4x4xf32, #tpu.memory_space<vmem>>, vector<1x1x1x1x4x4xf32>
    %21 = vector.shape_cast %20 : vector<1x1x1x1x4x4xf32> to vector<4x4xf32>
    %c0_39 = arith.constant 0 : index
    %c0_40 = arith.constant 0 : index
    %c0_41 = arith.constant 0 : index
    %c16 = arith.constant 16 : index
    %22 = vector.load %arg3[%c0_39, %c0_40, %c0_41, %c16] : memref<1x1x4x64xf32, #tpu.memory_space<vmem>>, vector<1x1x4x4xf32>
    %23 = vector.shape_cast %22 : vector<1x1x4x4xf32> to vector<4x4xf32>
    %24 = vector.shape_cast %21 : vector<4x4xf32> to vector<1x1x4x4xf32>
    tpu.vector_store %arg3[%c0_39, %c0_40, %c0_41, %c16], %24 {strides = array<i32>} : memref<1x1x4x64xf32, #tpu.memory_space<vmem>>, vector<1x1x4x4xf32>,
    %c0_42 = arith.constant 0 : index
    %c1_43 = arith.constant 1 : index
    %c0_44 = arith.constant 0 : index
    %c1_45 = arith.constant 1 : index
    %c0_46 = arith.constant 0 : index
    %c0_47 = arith.constant 0 : index
    %25 = vector.load %arg2[%c0_42, %c1_43, %c0_44, %c1_45, %c0_46, %c0_47] : memref<1x4x1x4x4x4xf32, #tpu.memory_space<vmem>>, vector<1x1x1x1x4x4xf32>
    %26 = vector.shape_cast %25 : vector<1x1x1x1x4x4xf32> to vector<4x4xf32>
    %c0_48 = arith.constant 0 : index
    %c0_49 = arith.constant 0 : index
    %c0_50 = arith.constant 0 : index
    %c20 = arith.constant 20 : index
    %27 = vector.load %arg3[%c0_48, %c0_49, %c0_50, %c20] : memref<1x1x4x64xf32, #tpu.memory_space<vmem>>, vector<1x1x4x4xf32>
    %28 = vector.shape_cast %27 : vector<1x1x4x4xf32> to vector<4x4xf32>
    %29 = vector.shape_cast %26 : vector<4x4xf32> to vector<1x1x4x4xf32>
    tpu.vector_store %arg3[%c0_48, %c0_49, %c0_50, %c20], %29 {strides = array<i32>} : memref<1x1x4x64xf32, #tpu.memory_space<vmem>>, vector<1x1x4x4xf32>,
    %c0_51 = arith.constant 0 : index
    %c1_52 = arith.constant 1 : index
    %c0_53 = arith.constant 0 : index
    %c2_54 = arith.constant 2 : index
    %c0_55 = arith.constant 0 : index
    %c0_56 = arith.constant 0 : index
    %30 = vector.load %arg2[%c0_51, %c1_52, %c0_53, %c2_54, %c0_55, %c0_56] : memref<1x4x1x4x4x4xf32, #tpu.memory_space<vmem>>, vector<1x1x1x1x4x4xf32>
    %31 = vector.shape_cast %30 : vector<1x1x1x1x4x4xf32> to vector<4x4xf32>
    %c0_57 = arith.constant 0 : index
    %c0_58 = arith.constant 0 : index
    %c0_59 = arith.constant 0 : index
    %c24 = arith.constant 24 : index
    %32 = vector.load %arg3[%c0_57, %c0_58, %c0_59, %c24] : memref<1x1x4x64xf32, #tpu.memory_space<vmem>>, vector<1x1x4x4xf32>
    %33 = vector.shape_cast %32 : vector<1x1x4x4xf32> to vector<4x4xf32>
    %34 = vector.shape_cast %31 : vector<4x4xf32> to vector<1x1x4x4xf32>
    tpu.vector_store %arg3[%c0_57, %c0_58, %c0_59, %c24], %34 {strides = array<i32>} : memref<1x1x4x64xf32, #tpu.memory_space<vmem>>, vector<1x1x4x4xf32>,
    %c0_60 = arith.constant 0 : index
    %c1_61 = arith.constant 1 : index
    %c0_62 = arith.constant 0 : index
    %c3_63 = arith.constant 3 : index
    %c0_64 = arith.constant 0 : index
    %c0_65 = arith.constant 0 : index
    %35 = vector.load %arg2[%c0_60, %c1_61, %c0_62, %c3_63, %c0_64, %c0_65] : memref<1x4x1x4x4x4xf32, #tpu.memory_space<vmem>>, vector<1x1x1x1x4x4xf32>
    %36 = vector.shape_cast %35 : vector<1x1x1x1x4x4xf32> to vector<4x4xf32>
    %c0_66 = arith.constant 0 : index
    %c0_67 = arith.constant 0 : index
    %c0_68 = arith.constant 0 : index
    %c28 = arith.constant 28 : index
    %37 = vector.load %arg3[%c0_66, %c0_67, %c0_68, %c28] : memref<1x1x4x64xf32, #tpu.memory_space<vmem>>, vector<1x1x4x4xf32>
    %38 = vector.shape_cast %37 : vector<1x1x4x4xf32> to vector<4x4xf32>
    %39 = vector.shape_cast %36 : vector<4x4xf32> to vector<1x1x4x4xf32>
    tpu.vector_store %arg3[%c0_66, %c0_67, %c0_68, %c28], %39 {strides = array<i32>} : memref<1x1x4x64xf32, #tpu.memory_space<vmem>>, vector<1x1x4x4xf32>,
    %c0_69 = arith.constant 0 : index
    %c2_70 = arith.constant 2 : index
    %c0_71 = arith.constant 0 : index
    %c0_72 = arith.constant 0 : index
    %c0_73 = arith.constant 0 : index
    %c0_74 = arith.constant 0 : index
    %40 = vector.load %arg2[%c0_69, %c2_70, %c0_71, %c0_72, %c0_73, %c0_74] : memref<1x4x1x4x4x4xf32, #tpu.memory_space<vmem>>, vector<1x1x1x1x4x4xf32>
    %41 = vector.shape_cast %40 : vector<1x1x1x1x4x4xf32> to vector<4x4xf32>
    %c0_75 = arith.constant 0 : index
    %c0_76 = arith.constant 0 : index
    %c0_77 = arith.constant 0 : index
    %c32 = arith.constant 32 : index
    %42 = vector.load %arg3[%c0_75, %c0_76, %c0_77, %c32] : memref<1x1x4x64xf32, #tpu.memory_space<vmem>>, vector<1x1x4x4xf32>
    %43 = vector.shape_cast %42 : vector<1x1x4x4xf32> to vector<4x4xf32>
    %44 = vector.shape_cast %41 : vector<4x4xf32> to vector<1x1x4x4xf32>
    tpu.vector_store %arg3[%c0_75, %c0_76, %c0_77, %c32], %44 {strides = array<i32>} : memref<1x1x4x64xf32, #tpu.memory_space<vmem>>, vector<1x1x4x4xf32>,
    %c0_78 = arith.constant 0 : index
    %c2_79 = arith.constant 2 : index
    %c0_80 = arith.constant 0 : index
    %c1_81 = arith.constant 1 : index
    %c0_82 = arith.constant 0 : index
    %c0_83 = arith.constant 0 : index
    %45 = vector.load %arg2[%c0_78, %c2_79, %c0_80, %c1_81, %c0_82, %c0_83] : memref<1x4x1x4x4x4xf32, #tpu.memory_space<vmem>>, vector<1x1x1x1x4x4xf32>
    %46 = vector.shape_cast %45 : vector<1x1x1x1x4x4xf32> to vector<4x4xf32>
    %c0_84 = arith.constant 0 : index
    %c0_85 = arith.constant 0 : index
    %c0_86 = arith.constant 0 : index
    %c36 = arith.constant 36 : index
    %47 = vector.load %arg3[%c0_84, %c0_85, %c0_86, %c36] : memref<1x1x4x64xf32, #tpu.memory_space<vmem>>, vector<1x1x4x4xf32>
    %48 = vector.shape_cast %47 : vector<1x1x4x4xf32> to vector<4x4xf32>
    %49 = vector.shape_cast %46 : vector<4x4xf32> to vector<1x1x4x4xf32>
    tpu.vector_store %arg3[%c0_84, %c0_85, %c0_86, %c36], %49 {strides = array<i32>} : memref<1x1x4x64xf32, #tpu.memory_space<vmem>>, vector<1x1x4x4xf32>,
    %c0_87 = arith.constant 0 : index
    %c2_88 = arith.constant 2 : index
    %c0_89 = arith.constant 0 : index
    %c2_90 = arith.constant 2 : index
    %c0_91 = arith.constant 0 : index
    %c0_92 = arith.constant 0 : index
    %50 = vector.load %arg2[%c0_87, %c2_88, %c0_89, %c2_90, %c0_91, %c0_92] : memref<1x4x1x4x4x4xf32, #tpu.memory_space<vmem>>, vector<1x1x1x1x4x4xf32>
    %51 = vector.shape_cast %50 : vector<1x1x1x1x4x4xf32> to vector<4x4xf32>
    %c0_93 = arith.constant 0 : index
    %c0_94 = arith.constant 0 : index
    %c0_95 = arith.constant 0 : index
    %c40 = arith.constant 40 : index
    %52 = vector.load %arg3[%c0_93, %c0_94, %c0_95, %c40] : memref<1x1x4x64xf32, #tpu.memory_space<vmem>>, vector<1x1x4x4xf32>
    %53 = vector.shape_cast %52 : vector<1x1x4x4xf32> to vector<4x4xf32>
    %54 = vector.shape_cast %51 : vector<4x4xf32> to vector<1x1x4x4xf32>
    tpu.vector_store %arg3[%c0_93, %c0_94, %c0_95, %c40], %54 {strides = array<i32>} : memref<1x1x4x64xf32, #tpu.memory_space<vmem>>, vector<1x1x4x4xf32>,
    %c0_96 = arith.constant 0 : index
    %c2_97 = arith.constant 2 : index
    %c0_98 = arith.constant 0 : index
    %c3_99 = arith.constant 3 : index
    %c0_100 = arith.constant 0 : index
    %c0_101 = arith.constant 0 : index
    %55 = vector.load %arg2[%c0_96, %c2_97, %c0_98, %c3_99, %c0_100, %c0_101] : memref<1x4x1x4x4x4xf32, #tpu.memory_space<vmem>>, vector<1x1x1x1x4x4xf32>
    %56 = vector.shape_cast %55 : vector<1x1x1x1x4x4xf32> to vector<4x4xf32>
    %c0_102 = arith.constant 0 : index
    %c0_103 = arith.constant 0 : index
    %c0_104 = arith.constant 0 : index
    %c44 = arith.constant 44 : index
    %57 = vector.load %arg3[%c0_102, %c0_103, %c0_104, %c44] : memref<1x1x4x64xf32, #tpu.memory_space<vmem>>, vector<1x1x4x4xf32>
    %58 = vector.shape_cast %57 : vector<1x1x4x4xf32> to vector<4x4xf32>
    %59 = vector.shape_cast %56 : vector<4x4xf32> to vector<1x1x4x4xf32>
    tpu.vector_store %arg3[%c0_102, %c0_103, %c0_104, %c44], %59 {strides = array<i32>} : memref<1x1x4x64xf32, #tpu.memory_space<vmem>>, vector<1x1x4x4xf32>,
    %c0_105 = arith.constant 0 : index
    %c3_106 = arith.constant 3 : index
    %c0_107 = arith.constant 0 : index
    %c0_108 = arith.constant 0 : index
    %c0_109 = arith.constant 0 : index
    %c0_110 = arith.constant 0 : index
    %60 = vector.load %arg2[%c0_105, %c3_106, %c0_107, %c0_108, %c0_109, %c0_110] : memref<1x4x1x4x4x4xf32, #tpu.memory_space<vmem>>, vector<1x1x1x1x4x4xf32>
    %61 = vector.shape_cast %60 : vector<1x1x1x1x4x4xf32> to vector<4x4xf32>
    %c0_111 = arith.constant 0 : index
    %c0_112 = arith.constant 0 : index
    %c0_113 = arith.constant 0 : index
    %c48 = arith.constant 48 : index
    %62 = vector.load %arg3[%c0_111, %c0_112, %c0_113, %c48] : memref<1x1x4x64xf32, #tpu.memory_space<vmem>>, vector<1x1x4x4xf32>
    %63 = vector.shape_cast %62 : vector<1x1x4x4xf32> to vector<4x4xf32>
    %64 = vector.shape_cast %61 : vector<4x4xf32> to vector<1x1x4x4xf32>
    tpu.vector_store %arg3[%c0_111, %c0_112, %c0_113, %c48], %64 {strides = array<i32>} : memref<1x1x4x64xf32, #tpu.memory_space<vmem>>, vector<1x1x4x4xf32>,
    %c0_114 = arith.constant 0 : index
    %c3_115 = arith.constant 3 : index
    %c0_116 = arith.constant 0 : index
    %c1_117 = arith.constant 1 : index
    %c0_118 = arith.constant 0 : index
    %c0_119 = arith.constant 0 : index
    %65 = vector.load %arg2[%c0_114, %c3_115, %c0_116, %c1_117, %c0_118, %c0_119] : memref<1x4x1x4x4x4xf32, #tpu.memory_space<vmem>>, vector<1x1x1x1x4x4xf32>
    %66 = vector.shape_cast %65 : vector<1x1x1x1x4x4xf32> to vector<4x4xf32>
    %c0_120 = arith.constant 0 : index
    %c0_121 = arith.constant 0 : index
    %c0_122 = arith.constant 0 : index
    %c52 = arith.constant 52 : index
    %67 = vector.load %arg3[%c0_120, %c0_121, %c0_122, %c52] : memref<1x1x4x64xf32, #tpu.memory_space<vmem>>, vector<1x1x4x4xf32>
    %68 = vector.shape_cast %67 : vector<1x1x4x4xf32> to vector<4x4xf32>
    %69 = vector.shape_cast %66 : vector<4x4xf32> to vector<1x1x4x4xf32>
    tpu.vector_store %arg3[%c0_120, %c0_121, %c0_122, %c52], %69 {strides = array<i32>} : memref<1x1x4x64xf32, #tpu.memory_space<vmem>>, vector<1x1x4x4xf32>,
    %c0_123 = arith.constant 0 : index
    %c3_124 = arith.constant 3 : index
    %c0_125 = arith.constant 0 : index
    %c2_126 = arith.constant 2 : index
    %c0_127 = arith.constant 0 : index
    %c0_128 = arith.constant 0 : index
    %70 = vector.load %arg2[%c0_123, %c3_124, %c0_125, %c2_126, %c0_127, %c0_128] : memref<1x4x1x4x4x4xf32, #tpu.memory_space<vmem>>, vector<1x1x1x1x4x4xf32>
    %71 = vector.shape_cast %70 : vector<1x1x1x1x4x4xf32> to vector<4x4xf32>
    %c0_129 = arith.constant 0 : index
    %c0_130 = arith.constant 0 : index
    %c0_131 = arith.constant 0 : index
    %c56 = arith.constant 56 : index
    %72 = vector.load %arg3[%c0_129, %c0_130, %c0_131, %c56] : memref<1x1x4x64xf32, #tpu.memory_space<vmem>>, vector<1x1x4x4xf32>
    %73 = vector.shape_cast %72 : vector<1x1x4x4xf32> to vector<4x4xf32>
    %74 = vector.shape_cast %71 : vector<4x4xf32> to vector<1x1x4x4xf32>
    tpu.vector_store %arg3[%c0_129, %c0_130, %c0_131, %c56], %74 {strides = array<i32>} : memref<1x1x4x64xf32, #tpu.memory_space<vmem>>, vector<1x1x4x4xf32>,
    %c0_132 = arith.constant 0 : index
    %c3_133 = arith.constant 3 : index
    %c0_134 = arith.constant 0 : index
    %c3_135 = arith.constant 3 : index
    %c0_136 = arith.constant 0 : index
    %c0_137 = arith.constant 0 : index
    %75 = vector.load %arg2[%c0_132, %c3_133, %c0_134, %c3_135, %c0_136, %c0_137] : memref<1x4x1x4x4x4xf32, #tpu.memory_space<vmem>>, vector<1x1x1x1x4x4xf32>
    %76 = vector.shape_cast %75 : vector<1x1x1x1x4x4xf32> to vector<4x4xf32>
    %c0_138 = arith.constant 0 : index
    %c0_139 = arith.constant 0 : index
    %c0_140 = arith.constant 0 : index
    %c60 = arith.constant 60 : index
    %77 = vector.load %arg3[%c0_138, %c0_139, %c0_140, %c60] : memref<1x1x4x64xf32, #tpu.memory_space<vmem>>, vector<1x1x4x4xf32>
    %78 = vector.shape_cast %77 : vector<1x1x4x4xf32> to vector<4x4xf32>
    %79 = vector.shape_cast %76 : vector<4x4xf32> to vector<1x1x4x4xf32>
    tpu.vector_store %arg3[%c0_138, %c0_139, %c0_140, %c60], %79 {strides = array<i32>} : memref<1x1x4x64xf32, #tpu.memory_space<vmem>>, vector<1x1x4x4xf32>,
    return
  }
  func.func @transform_0(%arg0: i32, %arg1: i32) -> (i32, i32, i32, i32, i32, i32) {
    %c0_i32 = arith.constant 0 : i32
    %c0_i32_0 = arith.constant 0 : i32
    %c0_i32_1 = arith.constant 0 : i32
    %c0_i32_2 = arith.constant 0 : i32
    %c0_i32_3 = arith.constant 0 : i32
    return %arg0, %c0_i32, %arg1, %c0_i32_0, %c0_i32_1, %c0_i32_2 : i32, i32, i32, i32, i32, i32
  }
  func.func @transform_1(%arg0: i32, %arg1: i32) -> (i32, i32, i32, i32) {
    %c0_i32 = arith.constant 0 : i32
    %c0_i32_0 = arith.constant 0 : i32
    %c0_i32_1 = arith.constant 0 : i32
    return %arg0, %arg1, %c0_i32, %c0_i32_0 : i32, i32, i32, i32
  }
}

</mosaic_0001>

<bundles_post_ra>
// kernel: tpu_custom_call.1
= control target key start
LH: loop header
LB: loop body
LE: loop exit
PB: predicated region body
PF: predicated region fallthrough
CT: control target
= control target key end

     0   :  { %6 = vsyncpa [#allocation3], 0  ;;  %s1196_s0 = inlined_call_operand.hbm [shape: f32[2,4,16,16], index: 0, kind: input, shape index: {}]   ;;  %s1197_s1 = inlined_call_operand.hbm [shape: f32[2,4,256], index: 1, kind: output, shape index: {}]  }
   0x1   :  { %8 = vsyncpa [#allocation3 + $0x1], 0 }
   0x2   :  { %9 = vsyncpa [#allocation4], 0 }
   0x3   :  { %11 = vsyncpa [#allocation4 + $0x1], 0  ;;  %s848_s6 = smov 0   ;;  %s850_s7 = smov 0  }
   0x4   :  { %s852_s8 = smov 0   ;;  %s854_s9 = smov 0  }
   0x5   :  { %s856_s10 = smov 0   ;;  %s858_s11 = smov 0  }
   0x6 LB: > { %s588_s12 = sadd.s32 4294967295, %s815_s11   ;;  %s589_s13 = sadd.s32 4294967294, %s815_s11   ;;  %s815_s11 = sphi %s858_s11, %s17_s11   ;;  %s811_s10 = sphi %s856_s10, %s1206_s10   ;;  %s807_s9 = sphi %s854_s9, %s1205_s9   ;;  %s803_s8 = sphi %s852_s8, %s1204_s8   ;;  %s799_s7 = sphi %s850_s7, %s1203_s7   ;;  %s795_s6 = sphi %s848_s6, %s1202_s6  }
   0x7   : > { %s29_s14 = sadd.s32 1, %s811_s10  ;;  %s38_s15 = sadd.s32 1, %s803_s8 }
   0x8   : > { %p31_p0 = scmp.ge.s32.totalorder %s29_s14, 2  ;;  %p45_p1 = scmp.ne.s32.totalorder %s803_s8, %s799_s7 }
   0x9   : > { %p46_p2 = scmp.eq.s32.totalorder %s815_s11, 0  ;;  %p51_p3 = scmp.ne.s32.totalorder %s799_s7, %s795_s6 }
   0xa   : > { %s1208_s14 = smov (%p31_p0, %s29_s14), 0  ;;  %p52_p5 = scmp.eq.s32.totalorder %s588_s12, 0 }
   0xb   : > { %p889_p4 = por %p46_p2, %p45_p1  ;;  %s33_s17 = ssub.s32 %s811_s10, %s1208_s14 }
   0xc   : > { %p77_p6 = scmp.eq.s32.totalorder %s588_s12, 1  ;;  %p36_p7 = scmp.eq.s32.totalorder %s33_s17, 0 }
   0xd   : > { %p895_p8 = por %p52_p5, %p51_p3  ;;  %p83_p10 = scmp.eq.s32.totalorder %s589_s13, 1 }
   0xe   : > { %p899_p9 = por %p77_p6, %p45_p1  ;;  %p591_p12 = scmp.ge.s32.totalorder %s815_s11, 2 }
   0xf   : > { %s904_s20 = scalar_select %p36_p7, %s803_s8, %s38_s15  }
  0x10   : > { %p906_p11 = por %p83_p10, %p51_p3  ;;  %p632_p13 = scmp.lt.s32.totalorder %s815_s11, 2 }
  0x11   : > { %s103_s22 = sand.u32 1, %s803_s8   ;;  %s618_s24 = sshll.u32 %s811_s10, 6 }
  0x12   : > { %s592_s23 = sshll.u32 %s103_s22, 6  ;;  %s114_s27 = scalar_lea.hbm %s1196_s0, %s618_s24 }
  0x13   : > { %s107_s28 = scalar_lea.vmem [#allocation2], %s592_s23  ;;  %s115_s30 = sshll.u32 %s114_s27, 4  ;;  %s116_s30 = int_to_ptr.hbm [resolvable:$true] %s115_s30 }
  0x14   : > { %s117_s29 = sshll.u32 %s107_s28, 4  ;;  %p625_p0 = pnand %p632_p13, %p889_p4  ;;  %s118_s29 = int_to_ptr.vmem [resolvable:$true] %s117_s29 }
  0x15   : > { %p595_p1 = scmp.ge.s32.totalorder %s815_s11, 1  ;;  %s104_s2 = scalar_lea.sflag [#allocation3], %s103_s22 }
  0x16   : > { %s817_s3 = smov 128   ;;  %s818_s4 = smov 8  }
  0x17   : > { %627 = dma.hbm_to_vmem [thread:$0]  (!%p625_p0), %s116_s30, 1024, %s118_s29, %s104_s2, %s817_s3, %s817_s3, %s818_s4  }
  0x18   : > { %p125_p2 = scmp.lt.s32.totalorder %s815_s11, 3 }
  0x1a   : > { %p126_p3 = pnand %p595_p1, %p125_p2 }
  0x1b   : > { %s922_s5 = sand.u32 (!%p126_p3), 1, %s799_s7  }
  0x1c   : > { %129 = sbr.rel (%p126_p3) target bundleno = 388 (0x184), region = 24  ;;  %s596_s12 = sshll.u32 (!%p126_p3), %s922_s5, 6 }
  0x1d   : > { %s132_s13 = scalar_lea.sflag (!%p126_p3), [#allocation3], %s922_s5  ;;  %s926_s15 = scalar_lea.vmem (!%p126_p3), [#allocation2], %s596_s12 }
  0x21   : > { %786 = dma.done.wait (%p895_p8), %s132_s13, 1024  }
  0x22   : > { %788 = vsyncadd (%p895_p8), %s132_s13, 4294966272  ;;  %v933_v0 = vld [vmem:[%s926_s15 + $0x3] ss:$4 sm:$0xf]  ;;  %s819_s16 = smov 12   ;;  %s820_s17 = smov 4  }
  0x23   : > { %v936_v1 = vld [vmem:[%s926_s15 + $0x1] ss:$4 sm:$0xf]  ;;  %196 = vrot.lane.b32.xlu1 %v933_v0, %s819_s16  ;;  %v943_v2 = vld [vmem:[%s926_s15 + $0x11] ss:$4 sm:$0xf] }
  0x24   : > { %188 = vrot.lane.b32.xlu0 %v936_v1, %s820_s17  ;;  %s821_s18 = smov 20   ;;  %v948_v3 = vld [vmem:[%s926_s15 + $0x10] ss:$4 sm:$0xf]  ;;  %s822_s22 = smov 16   ;;  %vm247_vm0 = vcmask 31744  }
  0x25   : > { %204 = vrot.lane.b32.xlu2 %v943_v2, %s821_s18  ;;  %v951_v4 = vld [vmem:[%s926_s15 + $0x2] ss:$4 sm:$0xf]  ;;  %s823_s23 = smov 8   ;;  %s824_s24 = smov 24   ;;  %vm249_vm1 = vcmask 64512  }
  0x26   : > { %v958_v5 = vld [vmem:[%s926_s15 + $0x12] ss:$4 sm:$0xf]  ;;  %v963_v6 = vld [vmem:[%s926_s15 + $0x20] ss:$4 sm:$0xf] }
  0x27   : > { %v966_v7 = vld [vmem:[%s926_s15 + $0x13] ss:$4 sm:$0xf]  ;;  %s825_s25 = smov 32   ;;  %s826_s26 = smov 28   ;;  %vm251_vm2 = vcmask 97280  }
  0x28   : > { %v973_v8 = vld [vmem:[%s926_s15 + $0x21] ss:$4 sm:$0xf]  ;;  %s827_s27 = smov 36   ;;  %s828_s28 = smov 44   ;;  %vm253_vm3 = vcmask 130048  }
  0x29   : > { %v978_v9 = vld [vmem:[%s926_s15 + $0x23] ss:$4 sm:$0xf]  ;;  %v981_v10 = vld [vmem:[%s926_s15 + $0x22] ss:$4 sm:$0xf] }
  0x2a   : > { %s829_s29 = smov 40   ;;  %v988_v11 = vld [vmem:[%s926_s15 + $0x30] ss:$4 sm:$0xf]  ;;  %s830_s30 = smov 48   ;;  %vm255_vm4 = vcmask 162816  }
  0x2b   : > { %200 = vrot.lane.b32.xlu1 %v948_v3, %s822_s22  ;;  %v993_v12 = vld [vmem:[%s926_s15 + $0x32] ss:$4 sm:$0xf]  ;;  %v996_v13 = vld [vmem:[%s926_s15 + $0x31] ss:$4 sm:$0xf] }
  0x2c   : > { %192 = vrot.lane.b32.xlu0 %v951_v4, %s823_s23  ;;  %s831_s2 = smov 56   ;;  %s832_s3 = smov 52   ;;  %v1002_v14 = vld [vmem:[%s926_s15 + $0x33] ss:$4 sm:$0xf]  ;;  %vm257_vm5 = vcmask 195584  }
  0x2d   : > { %208 = vrot.lane.b32.xlu2 %v958_v5, %s824_s24  ;;  %s833_s4 = smov 60   ;;  %v156_v15 = vld [vmem:[%s926_s15] ss:$4 sm:$0xf]  ;;  %s834_s12 = smov 124   ;;  %vm259_vm6 = vcmask 228352  }
  0x2e   : > { %s835_s13 = smov 120   ;;  %s836_s15 = smov 116   ;;  %vm261_vm7 = vcmask 261120   ;;  %vm263_vm8 = vcmask 293888   ;;  %vm265_vm9 = vcmask 326656   ;;  %vm267_vm10 = vcmask 359424  }
  0x2f   : > { %vm269_vm11 = vcmask 392192   ;;  %vm271_vm12 = vcmask 424960   ;;  %vm273_vm13 = vcmask 457728   ;;  %vm275_vm14 = vcmask 490496  }
  0x30   : > { %vm466_vm15 = vcmask 523264  }
  0x33   : > { %216 = vrot.lane.b32.xlu1 %v963_v6, %s825_s25 }
  0x34   : > { %212 = vrot.lane.b32.xlu0 %v966_v7, %s826_s26 }
  0x35   : > { %220 = vrot.lane.b32.xlu2 %v973_v8, %s827_s27 }
  0x3b   : > { %228 = vrot.lane.b32.xlu1 %v978_v9, %s828_s28 }
  0x3c   : > { %224 = vrot.lane.b32.xlu0 %v981_v10, %s829_s29 }
  0x3d   : > { %232 = vrot.lane.b32.xlu2 %v988_v11, %s830_s30 }
  0x43   : > { %240 = vrot.lane.b32.xlu1 %v993_v12, %s831_s2 }
  0x44   : > { %236 = vrot.lane.b32.xlu0 %v996_v13, %s832_s3 }
  0x45   : > { %244 = vrot.lane.b32.xlu2 %v1002_v14, %s833_s4 }
  0x4b   : > { %281 = vrot.lane.b32.xlu1 %v951_v4, %s820_s17 }
  0x4c   : > { %278 = vrot.lane.b32.xlu0 %v156_v15, %s834_s12 }
  0x4d   : > { %284 = vrot.lane.b32.xlu2 %v933_v0, %s823_s23 }
  0x53   : > { %290 = vrot.lane.b32.xlu1 %v943_v2, %s822_s22 }
  0x54   : > { %287 = vrot.lane.b32.xlu0 %v948_v3, %s819_s16 }
  0x55   : > { %293 = vrot.lane.b32.xlu2 %v958_v5, %s821_s18 }
  0x5b   : > { %299 = vrot.lane.b32.xlu1 %v963_v6, %s826_s26 }
  0x5c   : > { %296 = vrot.lane.b32.xlu0 %v966_v7, %s824_s24 }
  0x5d   : > { %302 = vrot.lane.b32.xlu2 %v973_v8, %s825_s25 }
  0x63   : > { %308 = vrot.lane.b32.xlu1 %v978_v9, %s829_s29 }
  0x64   : > { %305 = vrot.lane.b32.xlu0 %v981_v10, %s827_s27 }
  0x65   : > { %311 = vrot.lane.b32.xlu2 %v988_v11, %s828_s28 }
  0x6b   : > { %317 = vrot.lane.b32.xlu1 %v993_v12, %s832_s3 }
  0x6c   : > { %314 = vrot.lane.b32.xlu0 %v996_v13, %s830_s30 }
  0x6d   : > { %320 = vrot.lane.b32.xlu2 %v1002_v14, %s831_s2 }
  0x73   : > { %401 = vrot.lane.b32.xlu1 %v936_v1, %s835_s13 }
  0x74   : > { %398 = vrot.lane.b32.xlu0 %v156_v15, %s836_s15 }
  0x75   : > { %404 = vrot.lane.b32.xlu2 %v951_v4, %s834_s12 }
  0x7b   : > { %410 = vrot.lane.b32.xlu1 %v943_v2, %s823_s23 }
  0x7c   : > { %407 = vrot.lane.b32.xlu0 %v948_v3, %s820_s17 }
  0x7d   : > { %413 = vrot.lane.b32.xlu2 %v958_v5, %s819_s16 }
  0x7f   : > { %v205_v16 = vpop.permute.xlu2 %204 }
  0x83   : > { %419 = vrot.lane.b32.xlu1 %v963_v6, %s821_s18 }
  0x84   : > { %416 = vrot.lane.b32.xlu0 %v966_v7, %s822_s22 }
  0x85   : > { %422 = vrot.lane.b32.xlu2 %v973_v8, %s824_s24 }
  0x87   : > { %v209_v17 = vpop.permute.xlu2 %208 }
  0x8b   : > { %428 = vrot.lane.b32.xlu1 %v978_v9, %s825_s25 }
  0x8c   : > { %425 = vrot.lane.b32.xlu0 %v981_v10, %s826_s26 }
  0x8d   : > { %431 = vrot.lane.b32.xlu2 %v988_v11, %s827_s27 }
  0x8f   : > { %v221_v18 = vpop.permute.xlu2 %220 }
  0x93   : > { %437 = vrot.lane.b32.xlu1 %v993_v12, %s828_s28 }
  0x94   : > { %434 = vrot.lane.b32.xlu0 %v996_v13, %s829_s29 }
  0x95   : > { %v197_v19 = vpop.permute.xlu1 %196  ;;  %440 = vrot.lane.b32.xlu2 %v1002_v14, %s830_s30 }
  0x96   : > { %v189_v20 = vpop.permute.xlu0 %188 }
  0x97   : > { %v233_v21 = vpop.permute.xlu2 %232  ;;  %v248_v22 = vsel %vm247_vm0, %v156_v15, %v189_v20 }
  0x9b   : > { %341 = vrot.lane.b32.xlu1 %v936_v1, %s834_s12 }
  0x9c   : > { %338 = vrot.lane.b32.xlu0 %v156_v15, %s835_s13 }
  0x9d   : > { %v201_v23 = vpop.permute.xlu1 %200  ;;  %344 = vrot.lane.b32.xlu2 %v933_v0, %s820_s17  ;;  %s597_s17 = sshll.u32 %s922_s5, 3 }
  0x9e   : > { %v193_v24 = vpop.permute.xlu0 %192 }
  0x9f   : > { %v250_v25 = vsel %vm249_vm1, %v248_v22, %v193_v24  ;;  %v245_v29 = vpop.permute.xlu2 %244 }
  0xa0   : > { %v252_v26 = vsel %vm251_vm2, %v250_v25, %v197_v19 }
  0xa1   : > { %v254_v27 = vsel %vm253_vm3, %v252_v26, %v201_v23 }
  0xa2   : > { %v256_v28 = vsel %vm255_vm4, %v254_v27, %v205_v16 }
  0xa3   : > { %v258_v30 = vsel %vm257_vm5, %v256_v28, %v209_v17  ;;  %350 = vrot.lane.b32.xlu1 %v943_v2, %s819_s16  ;;  %s837_s16 = smov 64  }
  0xa4   : > { %347 = vrot.lane.b32.xlu0 %v948_v3, %s823_s23 }
  0xa5   : > { %v217_v31 = vpop.permute.xlu1 %216  ;;  %353 = vrot.lane.b32.xlu2 %v958_v5, %s822_s22 }
  0xa6   : > { %v213_v32 = vpop.permute.xlu0 %212 }
  0xa7   : > { %v260_v33 = vsel %vm259_vm6, %v258_v30, %v213_v32  ;;  %v285_v36 = vpop.permute.xlu2 %284 }
  0xa8   : > { %v262_v34 = vsel %vm261_vm7, %v260_v33, %v217_v31 }
  0xa9   : > { %v264_v35 = vsel %vm263_vm8, %v262_v34, %v221_v18 }
  0xab   : > { %359 = vrot.lane.b32.xlu1 %v963_v6, %s824_s24 }
  0xac   : > { %356 = vrot.lane.b32.xlu0 %v966_v7, %s821_s18  ;;  %s619_s18 = sshll.u32 %s807_s9, 3  ;;  %s477_s9 = scalar_lea.sflag [#allocation4], %s922_s5 }
  0xad   : > { %v229_v37 = vpop.permute.xlu1 %228  ;;  %362 = vrot.lane.b32.xlu2 %v973_v8, %s826_s26  ;;  %s490_s24 = scalar_lea.hbm %s1197_s1, %s619_s18 }
  0xae   : > { %v225_v38 = vpop.permute.xlu0 %224 }
  0xaf   : > { %v266_v39 = vsel %vm265_vm9, %v264_v35, %v225_v38  ;;  %v294_v42 = vpop.permute.xlu2 %293 }
  0xb0   : > { %v268_v40 = vsel %vm267_vm10, %v266_v39, %v229_v37 }
  0xb1   : > { %v270_v41 = vsel %vm269_vm11, %v268_v40, %v233_v21 }
  0xb3   : > { %368 = vrot.lane.b32.xlu1 %v978_v9, %s827_s27  ;;  %s494_s27 = sshll.u32 %s490_s24, 4  ;;  %s495_s27 = int_to_ptr.hbm [resolvable:$true] %s494_s27 }
  0xb4   : > { %365 = vrot.lane.b32.xlu0 %v981_v10, %s825_s25  ;;  %s154_s25 = scalar_lea.vmem [#allocation5], %s597_s17 }
  0xb5   : > { %v241_v43 = vpop.permute.xlu1 %240  ;;  %371 = vrot.lane.b32.xlu2 %v988_v11, %s829_s29  ;;  %s492_s26 = sshll.u32 %s154_s25, 4  ;;  %s493_s26 = int_to_ptr.vmem [resolvable:$true] %s492_s26 }
  0xb6   : > { %v237_v44 = vpop.permute.xlu0 %236 }
  0xb7   : > { %v272_v45 = vsel %vm271_vm12, %v270_v41, %v237_v44  ;;  %v303_v50 = vpop.permute.xlu2 %302 }
  0xb8   : > { %v274_v46 = vsel %vm273_vm13, %v272_v45, %v241_v43 }
  0xb9   : > { %v1098_v47 = vsel %vm275_vm14, %v274_v46, %v245_v29 }
  0xbb   : > { %377 = vrot.lane.b32.xlu1 %v993_v12, %s830_s30 }
  0xbc   : > { %374 = vrot.lane.b32.xlu0 %v996_v13, %s828_s28  ;;  %s747_s28 = sshra.s32 %s495_s27, 4  ;;  %s748_s28 = int_to_ptr.hbm [resolvable:$true] %s747_s28 }
  0xbd   : > { %v282_v48 = vpop.permute.xlu1 %281  ;;  %380 = vrot.lane.b32.xlu2 %v1002_v14, %s832_s3  ;;  %s749_s29 = scalar_lea.hbm %s748_s28, 8  ;;  %s753_s3 = scalar_lea.hbm %s1197_s1, 16 }
  0xbe   : > { %v279_v49 = vpop.permute.xlu0 %278  ;;  %p750_p4 = scmp.ne.s32.totalorder %s748_s28, %s749_s29  ;;  %p754_p7 = scmp.lt.s32.totalorder %s748_s28, %s1197_s1 }
  0xbf   : > { %v323_v51 = vsel %vm247_vm0, %v279_v49, %v936_v1  ;;  %v312_v56 = vpop.permute.xlu2 %311  ;;  %p755_p8 = scmp.lt.s32.totalorder %s753_s3, %s749_s29 }
  0xc0   : > { %v324_v52 = vsel %vm249_vm1, %v323_v51, %v282_v48  ;;  %p751_p5 = pnand %p750_p4, %p899_p9 }
  0xc1   : > { %v325_v55 = vsel %vm251_vm2, %v324_v52, %v285_v36  ;;  %p756_p10 = por %p755_p8, %p754_p7 }
  0xc2   : > { %p752_p6 = pneg %p751_p5 }
  0xc4   : > { %p757_p13 = pnand %p756_p10, %p752_p6 }
  0xc5   : > { %v291_v53 = vpop.permute.xlu1 %290 }
  0xc6   : > { %v288_v54 = vpop.permute.xlu0 %287 }
  0xc7   : > { %v326_v57 = vsel %vm253_vm3, %v325_v55, %v288_v54  ;;  %v321_v63 = vpop.permute.xlu2 %320 }
  0xc8   : > { %v327_v58 = vsel %vm255_vm4, %v326_v57, %v291_v53 }
  0xc9   : > { %v328_v61 = vsel %vm257_vm5, %v327_v58, %v294_v42 }
  0xcd   : > { %v300_v59 = vpop.permute.xlu1 %299 }
  0xce   : > { %v297_v60 = vpop.permute.xlu0 %296 }
  0xcf   : > { %v329_v62 = vsel %vm259_vm6, %v328_v61, %v297_v60  ;;  %v405_v8 = vpop.permute.xlu2 %404 }
  0xd0   : > { %v330_v1 = vsel %vm261_vm7, %v329_v62, %v300_v59 }
  0xd1   : > { %v331_v5 = vsel %vm263_vm8, %v330_v1, %v303_v50 }
  0xd5   : > { %v309_v2 = vpop.permute.xlu1 %308 }
  0xd6   : > { %v306_v3 = vpop.permute.xlu0 %305 }
  0xd7   : > { %v332_v6 = vsel %vm265_vm9, %v331_v5, %v306_v3  ;;  %v414_v17 = vpop.permute.xlu2 %413 }
  0xd8   : > { %v333_v7 = vsel %vm267_vm10, %v332_v6, %v309_v2 }
  0xd9   : > { %v334_v9 = vsel %vm269_vm11, %v333_v7, %v312_v56 }
  0xdd   : > { %v318_v10 = vpop.permute.xlu1 %317 }
  0xde   : > { %v315_v11 = vpop.permute.xlu0 %314 }
  0xdf   : > { %v335_v12 = vsel %vm271_vm12, %v334_v9, %v315_v11  ;;  %v423_v23 = vpop.permute.xlu2 %422 }
  0xe0   : > { %v336_v13 = vsel %vm273_vm13, %v335_v12, %v318_v10 }
  0xe1   : > { %v337_v14 = vsel %vm275_vm14, %v336_v13, %v321_v63 }
  0xe2   : > { %459 = vrot.lane.b32.xlu1 %v337_v14, %s837_s16 }
  0xe5   : > { %v402_v15 = vpop.permute.xlu1 %401 }
  0xe6   : > { %v399_v16 = vpop.permute.xlu0 %398 }
  0xe7   : > { %v443_v18 = vsel %vm247_vm0, %v399_v16, %v402_v15  ;;  %v432_v30 = vpop.permute.xlu2 %431 }
  0xe8   : > { %v444_v19 = vsel %vm249_vm1, %v443_v18, %v405_v8 }
  0xe9   : > { %v445_v22 = vsel %vm251_vm2, %v444_v19, %v933_v0 }
  0xed   : > { %v411_v21 = vpop.permute.xlu1 %410 }
  0xee   : > { %v408_v20 = vpop.permute.xlu0 %407 }
  0xef   : > { %v446_v24 = vsel %vm253_vm3, %v445_v22, %v408_v20  ;;  %v441_v36 = vpop.permute.xlu2 %440 }
  0xf0   : > { %v447_v25 = vsel %vm255_vm4, %v446_v24, %v411_v21 }
  0xf1   : > { %v448_v28 = vsel %vm257_vm5, %v447_v25, %v414_v17 }
  0xf5   : > { %v420_v27 = vpop.permute.xlu1 %419 }
  0xf6   : > { %v417_v26 = vpop.permute.xlu0 %416 }
  0xf7   : > { %v449_v29 = vsel %vm259_vm6, %v448_v28, %v417_v26  ;;  %v345_v45 = vpop.permute.xlu2 %344 }
  0xf8   : > { %v450_v31 = vsel %vm261_vm7, %v449_v29, %v420_v27 }
  0xf9   : > { %v451_v34 = vsel %vm263_vm8, %v450_v31, %v423_v23 }
  0xfd   : > { %v429_v33 = vpop.permute.xlu1 %428 }
  0xfe   : > { %v426_v32 = vpop.permute.xlu0 %425 }
  0xff   : > { %v452_v0 = vsel %vm265_vm9, %v451_v34, %v426_v32  ;;  %v354_v53 = vpop.permute.xlu2 %353 }
 0x100   : > { %v453_v35 = vsel %vm267_vm10, %v452_v0, %v429_v33 }
 0x101   : > { %v454_v37 = vsel %vm269_vm11, %v453_v35, %v432_v30 }
 0x105   : > { %v438_v39 = vpop.permute.xlu1 %437 }
 0x106   : > { %v435_v38 = vpop.permute.xlu0 %434 }
 0x107   : > { %v455_v40 = vsel %vm271_vm12, %v454_v37, %v435_v38  ;;  %v363_v59 = vpop.permute.xlu2 %362 }
 0x108   : > { %v456_v41 = vsel %vm273_vm13, %v455_v40, %v438_v39 }
 0x109   : > { %v457_v42 = vsel %vm275_vm14, %v456_v41, %v441_v36 }
 0x10a   : > { %463 = vrot.lane.b32.xlu0 %v457_v42, %s837_s16 }
 0x10d   : > { %v342_v43 = vpop.permute.xlu1 %341 }
 0x10e   : > { %v339_v44 = vpop.permute.xlu0 %338 }
 0x10f   : > { %v383_v46 = vsel %vm247_vm0, %v339_v44, %v342_v43  ;;  %v372_v1 = vpop.permute.xlu2 %371  ;;  %vm472_vm0 = vcmask 1043456  }
 0x110   : > { %v384_v49 = vsel %vm249_vm1, %v383_v46, %v951_v4 }
 0x111   : > { %v385_v51 = vsel %vm251_vm2, %v384_v49, %v345_v45 }
 0x115   : > { %v351_v48 = vpop.permute.xlu1 %350 }
 0x116   : > { %v348_v50 = vpop.permute.xlu0 %347 }
 0x117   : > { %v386_v52 = vsel %vm253_vm3, %v385_v51, %v348_v50  ;;  %v381_v8 = vpop.permute.xlu2 %380 }
 0x118   : > { %v387_v55 = vsel %vm255_vm4, %v386_v52, %v351_v48 }
 0x119   : > { %v388_v57 = vsel %vm257_vm5, %v387_v55, %v354_v53 }
 0x11d   : > { %v360_v54 = vpop.permute.xlu1 %359 }
 0x11e   : > { %v357_v56 = vpop.permute.xlu0 %356 }
 0x11f   : > { %v389_v58 = vsel %vm259_vm6, %v388_v57, %v357_v56 }
 0x120   : > { %v390_v60 = vsel %vm261_vm7, %v389_v58, %v360_v54 }
 0x121   : > { %v391_v62 = vsel %vm263_vm8, %v390_v60, %v363_v59 }
 0x125   : > { %v369_v4 = vpop.permute.xlu1 %368 }
 0x126   : > { %v366_v61 = vpop.permute.xlu0 %365 }
 0x127   : > { %v392_v63 = vsel %vm265_vm9, %v391_v62, %v366_v61 }
 0x128   : > { %v393_v2 = vsel %vm267_vm10, %v392_v63, %v369_v4 }
 0x129   : > { %v394_v5 = vsel %vm269_vm11, %v393_v2, %v372_v1 }
 0x12d   : > { %v378_v3 = vpop.permute.xlu1 %377 }
 0x12e   : > { %v375_v6 = vpop.permute.xlu0 %374 }
 0x12f   : > { %v395_v7 = vsel %vm271_vm12, %v394_v5, %v375_v6 }
 0x130   : > { %v396_v9 = vsel %vm273_vm13, %v395_v7, %v378_v3 }
 0x131   : > { %v397_v11 = vsel %vm275_vm14, %v396_v9, %v381_v8 }
 0x154   : > { %v460_v10 = vpop.permute.xlu1 %459 }
 0x155   : > { %v467_v15 = vsel %vm466_vm15, %v1098_v47, %v460_v10 }
 0x17c   : > { %v464_v12 = vpop.permute.xlu0 %463 }
 0x17d   : > { %v468_v13 = vsel %vm466_vm15, %v397_v11, %v464_v12 }
 0x17e   : > { %v471_v14 = vrot.slane %v468_v13, 4 }
 0x180   : > { %v473_v16 = vsel %vm472_vm0, %v467_v15, %v471_v14 }
 0x181   : > { %475 = vst [vmem:[%s154_s25] sm:$0xff] %v473_v16 }
 0x182   : > { %760 = shalt.err (!%p757_p13)
}
 0x183   : > { %622 = dma.vmem_to_hbm [thread:$0]  (%p899_p9), %s493_s26, 128, %s495_s27, %s477_s9  }
 0x184 PF: > { %s506_s5 = sand.u32 1, %s795_s6   ;;  %p629_p0 = pnand %p591_p12, %p906_p11 }
 0x185   : > { %s507_s13 = scalar_lea.sflag [#allocation4], %s506_s5 }
 0x186   : > { %p630_p1 = pneg %p629_p0 }
 0x188   : > { %790 = dma.done.wait (%p630_p1), %s507_s13, 128  }
 0x189   : > { %792 = vsyncadd (%p630_p1), %s507_s13, 4294967168  ;;  %s17_s11 = sadd.s32 1, %s815_s11   ;;  %s1202_s6 = smov %s799_s7 }
 0x18a   : > { %p14_p2 = scmp.ge.s32.totalorder %s17_s11, 4   ;;  %s1203_s7 = smov %s803_s8 }
 0x18b   : > { %s1204_s8 = smov %s904_s20  ;;  %s1205_s9 = smov %s811_s10 }
 0x18c   : > { %s1206_s10 = smov %s1208_s14  ;;  %16 = sbr.rel (!%p14_p2) target bundleno = 6 (0x6), region = 84 }
 0x191   :  { %513 = vsyncpa [#allocation3], 1 }
 0x192   :  { %515 = vsyncpa [#allocation3 + $0x1], 1 }
 0x193   :  { %516 = vsyncpa [#allocation4], 1 }
 0x194   :  { %518 = vsyncpa [#allocation4 + $0x1], 1 }

// kernel: tpu_custom_call.1
= control target key start
LH: loop header
LB: loop body
LE: loop exit
PB: predicated region body
PF: predicated region fallthrough
CT: control target
= control target key end

     0   :  { %6 = vsyncpa [#allocation3], 0  ;;  %s864_s0 = inlined_call_operand.hbm [shape: f32[2,4,4,4,4,4], index: 0, kind: input, shape index: {}]   ;;  %s865_s1 = inlined_call_operand.hbm [shape: f32[2,4,4,64], index: 1, kind: output, shape index: {}]  }
   0x1   :  { %8 = vsyncpa [#allocation3 + $0x1], 0 }
   0x2   :  { %9 = vsyncpa [#allocation4], 0 }
   0x3   :  { %11 = vsyncpa [#allocation4 + $0x1], 0  ;;  %s670_s6 = smov 0   ;;  %s672_s7 = smov 0  }
   0x4   :  { %s674_s8 = smov 0   ;;  %s676_s9 = smov 0  }
   0x5   :  { %s678_s10 = smov 0   ;;  %s680_s11 = smov 0  }
   0x6   :  { %s682_s12 = smov 0   ;;  %s684_s13 = smov 0  }
   0x7 LB: > { %s407_s14 = sadd.s32 4294967295, %s638_s13   ;;  %s408_s15 = sadd.s32 4294967294, %s638_s13   ;;  %s638_s13 = sphi %s684_s13, %s17_s13   ;;  %s634_s12 = sphi %s682_s12, %s882_s12   ;;  %s630_s11 = sphi %s680_s11, %s881_s11   ;;  %s626_s10 = sphi %s678_s10, %s880_s10   ;;  %s622_s9 = sphi %s676_s9, %s879_s9   ;;  %s618_s8 = sphi %s674_s8, %s878_s8   ;;  %s614_s7 = sphi %s672_s7, %s877_s7   ;;  %s610_s6 = sphi %s670_s6, %s876_s6  }
   0x8   : > { %s26_s16 = sadd.s32 1, %s630_s11  ;;  %s29_s17 = sadd.s32 1, %s634_s12 }
   0x9   : > { %p27_p0 = scmp.ge.s32.totalorder %s26_s16, 4  ;;  %p45_p1 = scmp.ne.s32.totalorder %s618_s8, %s614_s7 }
   0xa   : > { %p46_p2 = scmp.eq.s32.totalorder %s638_s13, 0  ;;  %p51_p5 = scmp.ne.s32.totalorder %s614_s7, %s610_s6 }
   0xb   : > { %s884_s16 = smov (%p27_p0, %s26_s16), 0  ;;  %s886_s17 = smov (!%p27_p0, %s29_s17), %s634_s12 }
   0xc   : > { %868 = sst [smem:[#allocation11_spill]] %s884_s16  ;;  %s34_s18 = ssub.s32 %s630_s11, %s884_s16 }
   0xd   : > { %p722_p3 = por %p46_p2, %p45_p1  ;;  %p31_p4 = scmp.ge.s32.totalorder %s886_s17, 2 }
   0xe   : > { %p52_p6 = scmp.eq.s32.totalorder %s407_s14, 0  ;;  %p77_p7 = scmp.eq.s32.totalorder %s407_s14, 7 }
   0xf   : > { %s888_s17 = smov (%p31_p4, %s886_s17), 0  ;;  %p83_p10 = scmp.eq.s32.totalorder %s408_s15, 7 }
  0x10   : > { %870 = sst [smem:[#allocation12_spill]] %s888_s17  ;;  %p730_p8 = por %p52_p6, %p51_p5 }
  0x11   : > { %p734_p9 = por %p77_p7, %p45_p1  ;;  %s33_s22 = ssub.s32 %s634_s12, %s888_s17 }
  0x12   : > { %s35_s23 = sor.u32 %s34_s18, %s33_s22  ;;  %s38_s24 = sadd.s32 1, %s618_s8 }
  0x13   : > { %p36_p11 = scmp.eq.s32.totalorder %s35_s23, 0  ;;  %p741_p12 = por %p83_p10, %p51_p5 }
  0x14   : > { %p410_p13 = scmp.ge.s32.totalorder %s638_s13, 8 }
  0x15   : > { %s746_s26 = scalar_select %p36_p11, %s618_s8, %s38_s24  }
  0x16   : > { %99 = sbr.rel (%p410_p13) target bundleno = 43 (0x2b), region = 16 }
  0x1b   : > { %s103_s27 = sand.u32 1, %s618_s8   ;;  %s412_s28 = sshll.u32 %s630_s11, 2 }
  0x1c   : > { %s411_s29 = sshll.u32 %s103_s27, 6  ;;  %s413_s30 = sshll.u32 %s634_s12, 6 }
  0x1d   : > { %s112_s2 = sadd.s32 %s413_s30, %s412_s28  ;;  %s107_s18 = scalar_lea.vmem [#allocation2], %s411_s29 }
  0x1e   : > { %s414_s3 = sshll.u32 %s112_s2, 2  ;;  %s129_s22 = sshll.u32 %s107_s18, 4  ;;  %s130_s22 = int_to_ptr.vmem [resolvable:$true] %s129_s22 }
  0x1f   : > { %s114_s14 = scalar_lea.hbm %s864_s0, %s414_s3  ;;  %s640_s23 = smov 1024  }
  0x20   : > { %s440_s15 = scalar_select %p722_p3, [#allocation0], [#allocation8] }
  0x21   : > { %441 = sst [smem:[#allocation7]] (%p722_p3), %s640_s23  ;;  %s127_s17 = sshll.u32 %s114_s14, 4  ;;  %s128_s17 = int_to_ptr.hbm [resolvable:$true] %s127_s17 }
  0x22   : > { %s119_s24 = sld [smem:[%s440_s15]]   ;;  %s641_s16 = smov 256  }
  0x23   : > { %442 = sst [smem:[#allocation7 + $0x1]] (%p722_p3), %s641_s16  ;;  %s642_s28 = smov 4  }
  0x24   : > { %443 = sst [smem:[#allocation7 + $0x2]] (%p722_p3), %s642_s28  ;;  %s643_s30 = smov 64  }
  0x25   : > { %444 = sst [smem:[#allocation7 + $0x3]] (%p722_p3), %s643_s30  ;;  %s104_s3 = scalar_lea.sflag [#allocation3], %s103_s27 }
  0x26   : > { %445 = sst [smem:[#allocation7 + $0x4]] (%p722_p3), %s643_s30  ;;  %s644_s4 = smov [#allocation6]  }
  0x27   : > { %446 = sst [smem:[#allocation7 + $0x5]] (%p722_p3), %s642_s28 }
  0x28   : > { %s415_s29 = sshll.u32 %s119_s24, 26 }
  0x29   : > { %s416_s2 = sadd.s32 134217728, %s415_s29 }
  0x2a   : > { %447 = dma.general (%p722_p3), %s128_s17, 1024, %s130_s22, %s104_s3, %s644_s4, [#allocation7], %s416_s2, 0  }
  0x2b PF: > { %p417_p0 = scmp.ge.s32.totalorder %s638_s13, 1  ;;  %p150_p1 = scmp.lt.s32.totalorder %s638_s13, 9 }
  0x2d   : > { %p151_p2 = pnand %p417_p0, %p150_p1 }
  0x2e   : > { %s774_s16 = sand.u32 (!%p151_p2), 1, %s614_s7  }
  0x2f   : > { %154 = sbr.rel (%p151_p2) target bundleno = 206 (0xce), region = 24  ;;  %s418_s5 = sshll.u32 (!%p151_p2), %s774_s16, 6 }
  0x30   : > { %s157_s14 = scalar_lea.sflag (!%p151_p2), [#allocation3], %s774_s16  ;;  %s778_s15 = scalar_lea.vmem (!%p151_p2), [#allocation2], %s418_s5 }
  0x34   : > { %601 = dma.done.wait (%p730_p8), %s157_s14, 1024  }
  0x35   : > { %603 = vsyncadd (%p730_p8), %s157_s14, 4294966272  ;;  %v420_v0 = vld [vmem:[%s778_s15 + $0x4] sm:$0xf]  ;;  %v422_v1 = vld [vmem:[%s778_s15 + $0xc] sm:$0xf]  ;;  %s645_s17 = smov 4  }
  0x36   : > { %186 = vrot.lane.b32.xlu0 %v420_v0, %s645_s17  ;;  %s646_s19 = smov 12   ;;  %v424_v2 = vld [vmem:[%s778_s15 + $0x14] sm:$0xf]  ;;  %s647_s27 = smov 20   ;;  %v421_v3 = vld [vmem:[%s778_s15 + $0x8] sm:$0xf] }
  0x37   : > { %202 = vrot.lane.b32.xlu1 %v422_v1, %s646_s19  ;;  %218 = vrot.lane.b32.xlu2 %v424_v2, %s647_s27  ;;  %v423_v4 = vld [vmem:[%s778_s15 + $0x10] sm:$0xf]  ;;  %s648_s20 = smov 8   ;;  %s649_s18 = smov 16   ;;  %v425_v5 = vld [vmem:[%s778_s15 + $0x18] sm:$0xf] }
  0x38   : > { %s650_s22 = smov 24   ;;  %v426_v6 = vld [vmem:[%s778_s15 + $0x1c] sm:$0xf]  ;;  %v427_v7 = vld [vmem:[%s778_s15 + $0x20] sm:$0xf]  ;;  %s651_s23 = smov 28  }
  0x39   : > { %s652_s24 = smov 32   ;;  %v428_v8 = vld [vmem:[%s778_s15 + $0x24] sm:$0xf]  ;;  %s653_s28 = smov 36   ;;  %v429_v9 = vld [vmem:[%s778_s15 + $0x28] sm:$0xf] }
  0x3a   : > { %v430_v10 = vld [vmem:[%s778_s15 + $0x2c] sm:$0xf]  ;;  %s654_s30 = smov 40   ;;  %s655_s29 = smov 44   ;;  %v431_v11 = vld [vmem:[%s778_s15 + $0x30] sm:$0xf] }
  0x3b   : > { %s656_s2 = smov 48   ;;  %v432_v12 = vld [vmem:[%s778_s15 + $0x34] sm:$0xf]  ;;  %v433_v13 = vld [vmem:[%s778_s15 + $0x38] sm:$0xf]  ;;  %s657_s3 = smov 52  }
  0x3c   : > { %s658_s4 = smov 56   ;;  %v434_v14 = vld [vmem:[%s778_s15 + $0x3c] sm:$0xf]  ;;  %s659_s5 = smov 60   ;;  %vm181_vm0 = vcmask 27648   ;;  %vm189_vm1 = vcmask 60448  }
  0x3d   : > { %s419_s14 = sshll.u32 %s774_s16, 2  ;;  %v180_v15 = vld [vmem:[%s778_s15] sm:$0xf]  ;;  %vm197_vm2 = vcmask 93248   ;;  %vm205_vm3 = vcmask 126048   ;;  %vm213_vm4 = vcmask 158848  }
  0x3e   : > { %194 = vrot.lane.b32.xlu0 %v421_v3, %s648_s20  ;;  %s801_s17 = scalar_lea.vmem [#allocation5], %s419_s14  ;;  %vm221_vm5 = vcmask 191648   ;;  %vm229_vm6 = vcmask 224448   ;;  %vm237_vm7 = vcmask 257248   ;;  %vm245_vm8 = vcmask 290048   ;;  %s436_s15 = sshll.u32 %s626_s10, 2 }
  0x3f   : > { %210 = vrot.lane.b32.xlu1 %v423_v4, %s649_s18  ;;  %226 = vrot.lane.b32.xlu2 %v425_v5, %s650_s22  ;;  %182 = vst.msk [vmem:[%s801_s17] sm:$0xf] %vm181_vm0, %v180_v15  ;;  %vm253_vm9 = vcmask 322848   ;;  %s314_s19 = sadd.s32 %s622_s9, %s436_s15  ;;  %vm261_vm10 = vcmask 355648   ;;  %vm269_vm11 = vcmask 388448   ;;  %vm277_vm12 = vcmask 421248  }
  0x40   : > { %s437_s27 = sshll.u32 %s314_s19, 2  ;;  %vm285_vm13 = vcmask 454048   ;;  %s318_s22 = sshll.u32 %s801_s17, 4  ;;  %vm293_vm14 = vcmask 486848   ;;  %vm301_vm15 = vcmask 519648   ;;  %s319_s22 = int_to_ptr.vmem [resolvable:$true] %s318_s22 }
  0x41   : > { %s316_s10 = scalar_lea.hbm %s865_s1, %s437_s27 }
  0x42   : > { %s320_s9 = sshll.u32 %s316_s10, 4  ;;  %s321_s9 = int_to_ptr.hbm [resolvable:$true] %s320_s9 }
  0x46   : > { %234 = vrot.lane.b32.xlu0 %v426_v6, %s651_s23  ;;  %s304_s23 = scalar_lea.sflag [#allocation4], %s774_s16 }
  0x47   : > { %242 = vrot.lane.b32.xlu1 %v427_v7, %s652_s24  ;;  %250 = vrot.lane.b32.xlu2 %v428_v8, %s653_s28  ;;  %s554_s24 = sshra.s32 %s321_s9, 4  ;;  %s555_s24 = int_to_ptr.hbm [resolvable:$true] %s554_s24 }
  0x48   : > { %s556_s28 = scalar_lea.hbm %s555_s24, 4  ;;  %p561_p6 = scmp.lt.s32.totalorder %s555_s24, %s865_s1 }
  0x49   : > { %p557_p3 = scmp.ne.s32.totalorder %s555_s24, %s556_s28 }
  0x4b   : > { %p558_p4 = pnand %p557_p3, %p734_p9 }
  0x4d   : > { %p559_p5 = pneg %p558_p4 }
  0x4e   : > { %258 = vrot.lane.b32.xlu0 %v429_v9, %s654_s30 }
  0x4f   : > { %266 = vrot.lane.b32.xlu1 %v430_v10, %s655_s29  ;;  %274 = vrot.lane.b32.xlu2 %v431_v11, %s656_s2  ;;  %s560_s2 = scalar_lea.hbm %s865_s1, 32 }
  0x50   : > { %p562_p7 = scmp.lt.s32.totalorder %s560_s2, %s556_s28 }
  0x52   : > { %p563_p8 = por %p562_p7, %p561_p6 }
  0x54   : > { %p564_p10 = pnand %p563_p8, %p559_p5 }
  0x56   : > { %282 = vrot.lane.b32.xlu0 %v432_v12, %s657_s3 }
  0x57   : > { %290 = vrot.lane.b32.xlu1 %v433_v13, %s658_s4  ;;  %298 = vrot.lane.b32.xlu2 %v434_v14, %s659_s5 }
  0x91   : > { %v219_v16 = vpop.permute.xlu2 %218 }
  0x99   : > { %v227_v19 = vpop.permute.xlu2 %226 }
  0xa1   : > { %v251_v22 = vpop.permute.xlu2 %250 }
  0xa8   : > { %v187_v17 = vpop.permute.xlu0 %186 }
  0xa9   : > { %v203_v18 = vpop.permute.xlu1 %202  ;;  %190 = vst.msk [vmem:[%s801_s17] sm:$0xf] %vm189_vm1, %v187_v17  ;;  %v275_v25 = vpop.permute.xlu2 %274 }
  0xb0   : > { %v195_v20 = vpop.permute.xlu0 %194 }
  0xb1   : > { %v211_v21 = vpop.permute.xlu1 %210  ;;  %198 = vst.msk [vmem:[%s801_s17] sm:$0xf] %vm197_vm2, %v195_v20  ;;  %v299_v28 = vpop.permute.xlu2 %298 }
  0xb2   : > { %206 = vst.msk [vmem:[%s801_s17] sm:$0xf] %vm205_vm3, %v203_v18 }
  0xb3   : > { %214 = vst.msk [vmem:[%s801_s17] sm:$0xf] %vm213_vm4, %v211_v21 }
  0xb4   : > { %222 = vst.msk [vmem:[%s801_s17] sm:$0xf] %vm221_vm5, %v219_v16 }
  0xb5   : > { %230 = vst.msk [vmem:[%s801_s17] sm:$0xf] %vm229_vm6, %v227_v19 }
  0xb8   : > { %v235_v23 = vpop.permute.xlu0 %234 }
  0xb9   : > { %v243_v24 = vpop.permute.xlu1 %242  ;;  %238 = vst.msk [vmem:[%s801_s17] sm:$0xf] %vm237_vm7, %v235_v23 }
  0xba   : > { %246 = vst.msk [vmem:[%s801_s17] sm:$0xf] %vm245_vm8, %v243_v24 }
  0xbb   : > { %254 = vst.msk [vmem:[%s801_s17] sm:$0xf] %vm253_vm9, %v251_v22 }
  0xc0   : > { %v259_v26 = vpop.permute.xlu0 %258 }
  0xc1   : > { %v267_v27 = vpop.permute.xlu1 %266  ;;  %262 = vst.msk [vmem:[%s801_s17] sm:$0xf] %vm261_vm10, %v259_v26 }
  0xc2   : > { %270 = vst.msk [vmem:[%s801_s17] sm:$0xf] %vm269_vm11, %v267_v27 }
  0xc3   : > { %278 = vst.msk [vmem:[%s801_s17] sm:$0xf] %vm277_vm12, %v275_v25 }
  0xc8   : > { %v283_v29 = vpop.permute.xlu0 %282 }
  0xc9   : > { %v291_v30 = vpop.permute.xlu1 %290  ;;  %286 = vst.msk [vmem:[%s801_s17] sm:$0xf] %vm285_vm13, %v283_v29 }
  0xca   : > { %294 = vst.msk [vmem:[%s801_s17] sm:$0xf] %vm293_vm14, %v291_v30 }
  0xcb   : > { %302 = vst.msk [vmem:[%s801_s17] sm:$0xf] %vm301_vm15, %v299_v28 }
  0xcc   : > { %567 = shalt.err (!%p564_p10)
}
  0xcd   : > { %449 = dma.vmem_to_hbm [thread:$0]  (%p734_p9), %s319_s22, 64, %s321_s9, %s304_s23  }
  0xce PF: > { %p455_p11 = scmp.ge.s32.totalorder %s638_s13, 2  ;;  %s332_s16 = sand.u32 1, %s610_s6  }
  0xcf   : > { %s333_s5 = scalar_lea.sflag [#allocation4], %s332_s16 }
  0xd0   : > { %p452_p13 = pnand %p455_p11, %p741_p12 }
  0xd2   : > { %p453_p0 = pneg %p452_p13 }
  0xd4   : > { %605 = dma.done.wait (%p453_p0), %s333_s5, 64  }
  0xd5   : > { %607 = vsyncadd (%p453_p0), %s333_s5, 4294967232  ;;  %s17_s13 = sadd.s32 1, %s638_s13   ;;  %s874_s21 = sld [smem:[#allocation11_spill]] }
  0xd6   : > { %p14_p1 = scmp.ge.s32.totalorder %s17_s13, 10   ;;  %s875_s14 = sld [smem:[#allocation12_spill]] }
  0xd7   : > { %s876_s6 = smov %s614_s7  ;;  %s877_s7 = smov %s618_s8 }
  0xd8   : > { %s878_s8 = smov %s746_s26  ;;  %s879_s9 = smov %s630_s11 }
  0xd9   : > { %s880_s10 = smov %s634_s12  ;;  %16 = sbr.rel (!%p14_p1) target bundleno = 7 (0x7), region = 89 }
  0xdb   : > { %s881_s11 = smov %s874_s21 }
  0xdc   : > { %s882_s12 = smov %s875_s14 }
  0xde   :  { %339 = vsyncpa [#allocation3], 1 }
  0xdf   :  { %341 = vsyncpa [#allocation3 + $0x1], 1 }
  0xe0   :  { %342 = vsyncpa [#allocation4], 1 }
  0xe1   :  { %344 = vsyncpa [#allocation4 + $0x1], 1 }

</bundles_post_ra>
